<compile_context>
chip_gen: v7x
topology: tpu7x:2x2x1
jax: 0.10.0
libtpu: 0.0.40
codegen_flags: <defaults>
</compile_context>

<pallas_src>
import functools
import math

import jax
import jax.numpy as jnp
from jax.experimental import pallas as pl
from jax.experimental.pallas import tpu as pltpu


NEG_SLOPE = 0.01   # F.leaky_relu default negative_slope (spec calls it w/o arg)
TL_MAX = 512       # rows (M) per MXU matmul tile
OUT_CPAD = 128     # lane-dense channel padding for the Cout=1 output conv

# (Cin, Cout, K, stride, pad) for the 4 convs and the output conv.
CONV_CFG = [
    (1, 32, 5, 3, 2),
    (32, 128, 5, 3, 2),
    (128, 256, 5, 3, 2),
    (256, 256, 5, 3, 2),
]
OUT_CFG = (256, 1, 3, 1, 1)


def _round_up(x, m):
    return (x + m - 1) // m * m


# ----------------------------------------------------------------------------
# Pallas kernel: (TL, K*Cin) x (K*Cin, Cout) matmul + bias + optional LeakyReLU
# ----------------------------------------------------------------------------
def _matmul_bias_act_kernel(x_ref, w_ref, b_ref, o_ref, *, neg_slope):
    # x_ref: (TL, K*Cin) bf16; w_ref: (K*Cin, Cout) bf16; b_ref: (1, Cout) f32
    # o_ref: (TL, Cout) bf16/f32
    acc = jnp.dot(x_ref[...], w_ref[...], preferred_element_type=jnp.float32)
    acc = acc + b_ref[...]
    if neg_slope is not None:
        acc = jnp.where(acc >= 0.0, acc, neg_slope * acc)
    o_ref[...] = acc.astype(o_ref.dtype)


def conv1d_mxu(x, w_dense, bias, *, ksize, stride, pad, neg_slope, out_dtype):
    """Strided, padded 1-D conv along axis 1 of x, as one row-tiled GEMM.

    x:       (N, H, Cin), channels on lanes (any float dtype; panels cast bf16).
    w_dense: (K*Cin, Cout) float32 (row k*Cin + c == w_pt[:, c, k]).
    bias:    (Cout,) float32.
    Returns (N, L_out, Cout) in `out_dtype`.
    """
    N, H, Cin = x.shape
    KCin, Cout = w_dense.shape
    assert KCin == ksize * Cin
    L_out = (H + 2 * pad - ksize) // stride + 1

    # Zero-pad the time axis so every tap of every valid output row is in-bounds.
    needed = (L_out - 1) * stride + ksize
    pad_right = max(needed - pad - H, 0)
    xp = jnp.pad(x, ((0, 0), (pad, pad_right), (0, 0)))

    # im2col: fold the K taps into the contraction dim.  This (and the slices /
    # casts below) is XLA glue fused under jit, not the Pallas hot path.
    taps = [xp[:, k:k + (L_out - 1) * stride + 1:stride, :] for k in range(ksize)]
    xcol = jnp.stack(taps, axis=2).reshape(N, L_out, KCin)

    # Fold N into the matmul M dimension: one 1-D grid of big row tiles.
    M = N * L_out
    TL = min(TL_MAX, _round_up(M, 16))
    M_pad = _round_up(M, TL)
    xflat = xcol.reshape(M, KCin).astype(jnp.bfloat16)
    xflat = jnp.pad(xflat, ((0, M_pad - M), (0, 0)))
    wq = w_dense.astype(jnp.bfloat16)
    b2 = bias.reshape(1, Cout).astype(jnp.float32)

    kernel = functools.partial(_matmul_bias_act_kernel, neg_slope=neg_slope)
    out = pl.pallas_call(
        kernel,
        out_shape=jax.ShapeDtypeStruct((M_pad, Cout), out_dtype),
        grid=(M_pad // TL,),
        in_specs=[
            pl.BlockSpec((TL, KCin), lambda i: (i, 0)),
            pl.BlockSpec((KCin, Cout), lambda i: (0, 0)),
            pl.BlockSpec((1, Cout), lambda i: (0, 0)),
        ],
        out_specs=pl.BlockSpec((TL, Cout), lambda i: (i, 0)),
        compiler_params=pltpu.CompilerParams(
            dimension_semantics=("parallel",)),   # shards across TCs on v7x
    )(xflat, wq, b2)
    # Padded rows are dropped lazily; this slice+reshape fuses into consumers
    # (next layer's im2col fusion / the feature transpose), no standalone copy.
    return out[:M].reshape(N, L_out, Cout)


# ----------------------------------------------------------------------------
# Parameters (plain-JAX glue; raw PyTorch-layout weights are stored)
# ----------------------------------------------------------------------------
def _dense_weight(w):
    """(Cout, Cin, K) -> (K*Cin, Cout), tap-major rows matching the im2col."""
    cout, cin, k = w.shape
    return jnp.transpose(w, (2, 1, 0)).reshape(k * cin, cout)


def init_submpd_params(key):
    convs = []
    for (cin, cout, k, _, _) in CONV_CFG:
        key, wk, bk = jax.random.split(key, 3)
        # weights_init: conv weights ~ N(0, 0.02); bias keeps PyTorch's default
        # uniform(-1/sqrt(fan_in), 1/sqrt(fan_in)) init.
        w = 0.02 * jax.random.normal(wk, (cout, cin, k), jnp.float32)
        bound = 1.0 / math.sqrt(cin * k)
        b = jax.random.uniform(bk, (cout,), jnp.float32, -bound, bound)
        # weight_norm at init is the identity reparameterization -> raw w.
        convs.append({"w": w, "b": b})
    cin, cout, k, _, _ = OUT_CFG
    key, wk, bk = jax.random.split(key, 3)
    bound = 1.0 / math.sqrt(cin * k)   # out conv keeps PyTorch default init
    w = jax.random.uniform(wk, (cout, cin, k), jnp.float32, -bound, bound)
    b = jax.random.uniform(bk, (cout,), jnp.float32, -bound, bound)
    return {"convs": convs, "out": {"w": w, "b": b}}


# ----------------------------------------------------------------------------
# Forward pass (matches SubMPD.forward semantics)
# ----------------------------------------------------------------------------
def submpd_forward(x, params, *, period):
    """x: (B, 1, T).  Returns (out, features):
    out (B, 1, H_out, period) f32; features: 4 tensors in NCHW layout, f32."""
    B, _, T = x.shape
    if T % period != 0:
        pad_len = period - T % period
        x = jnp.pad(x, ((0, 0), (0, 0), (0, pad_len)), mode="reflect")
        T = T + pad_len
    H = T // period
    # (B, 1, T) -> (B, 1, H, period); column w is the sequence x[b, 0, w::period].
    # Fold (B, period) into a batch of N independent 1-D sequences (N, H, 1).
    h = jnp.transpose(x.reshape(B, H, period), (0, 2, 1)).reshape(B * period, H, 1)

    features = []
    for (cin, cout, k, s, p), lyr in zip(CONV_CFG, params["convs"]):
        h = conv1d_mxu(h, _dense_weight(lyr["w"]), lyr["b"],
                       ksize=k, stride=s, pad=p, neg_slope=NEG_SLOPE,
                       out_dtype=jnp.bfloat16)
        L, C = h.shape[1], h.shape[2]
        # Back to PyTorch NCHW for the returned feature maps; the f32 cast rides
        # the (required) transpose copy.  (Keeping these bf16 / deferring the
        # transpose to the consumer would halve feature writeback if allowed.)
        features.append(
            jnp.transpose(h.reshape(B, period, L, C), (0, 3, 2, 1))
            .astype(jnp.float32))

    # Final Cout=1 conv: pad weights/bias to 128 output channels so the kernel
    # writes lane-dense, unmasked (TL, 128) blocks; column 0 is sliced below.
    cin, cout, k, s, p = OUT_CFG
    w_out = jnp.pad(_dense_weight(params["out"]["w"]),
                    ((0, 0), (0, OUT_CPAD - cout)))
    b_out = jnp.pad(params["out"]["b"], (0, OUT_CPAD - cout))
    o = conv1d_mxu(h, w_out, b_out, ksize=k, stride=s, pad=p, neg_slope=None,
                   out_dtype=jnp.float32)
    L = o.shape[1]
    o = jnp.transpose(o[..., :1].reshape(B, period, L, 1), (0, 3, 2, 1))
    return o, features


# ----------------------------------------------------------------------------
# Pure-JAX reference (mirrors the PyTorch module) for a numeric sanity check.
# ----------------------------------------------------------------------------
def _ref_forward(x, params, *, period):
    B, _, T = x.shape
    if T % period != 0:
        x = jnp.pad(x, ((0, 0), (0, 0), (0, period - T % period)), mode="reflect")
        T = x.shape[-1]
    h = x.reshape(B, 1, T // period, period)
    feats = []
    for (cin, cout, k, s, p), lyr in zip(CONV_CFG, params["convs"]):
        h = jax.lax.conv_general_dilated(
            h, lyr["w"][..., None], window_strides=(s, 1),
            padding=((p, p), (0, 0)),
            dimension_numbers=("NCHW", "OIHW", "NCHW"))
        h = h + lyr["b"][None, :, None, None]
        h = jnp.where(h >= 0.0, h, NEG_SLOPE * h)
        feats.append(h)
    cin, cout, k, s, p = OUT_CFG
    o = jax.lax.conv_general_dilated(
        h, params["out"]["w"][..., None], window_strides=(s, 1),
        padding=((p, p), (0, 0)),
        dimension_numbers=("NCHW", "OIHW", "NCHW"))
    o = o + params["out"]["b"][None, :, None, None]
    return o, feats


if __name__ == "__main__":
    key = jax.random.PRNGKey(0)
    kx, kp = jax.random.split(key)

    B, T, period = 2, 485, 3          # T % period != 0 -> exercises reflect pad
    x = jax.random.normal(kx, (B, 1, T), jnp.float32)
    params = init_submpd_params(kp)

    fwd = jax.jit(functools.partial(submpd_forward, period=period))
    out, feats = fwd(x, params)
    jax.block_until_ready((out, feats))

    # Shape checks against the PyTorch reference semantics.
    T_pad = T + (period - T % period) % period
    h_len = T_pad // period
    assert len(feats) == 4
    for (cin, cout, k, s, p), f in zip(CONV_CFG, feats):
        h_len = (h_len + 2 * p - k) // s + 1
        assert f.shape == (B, cout, h_len, period), f.shape
    assert out.shape == (B, 1, h_len, period), out.shape
    assert bool(jnp.all(jnp.isfinite(out)))

    # Numeric check vs. a pure-JAX (f32) reference; bf16 intermediates give
    # ~1e-2-scale deviations, so the tolerance is loose but meaningful.
    ref_out, ref_feats = jax.jit(functools.partial(_ref_forward, period=period))(
        x, params)
    jax.block_until_ready((ref_out, ref_feats))
    assert float(jnp.max(jnp.abs(out - ref_out))) < 0.08
    for f, rf in zip(feats, ref_feats):
        assert f.shape == rf.shape
        assert float(jnp.max(jnp.abs(f - rf))) < 0.08

    print("KERNEL_OK")
</pallas_src>

<mosaic_0001>
module attributes {stable_mosaic.version = 11 : i64} {
  func.func @_matmul_bias_act_kernel(%arg0: i32, %arg1: memref<336x5xbf16, #tpu.memory_space<vmem>>, %arg2: memref<5x32xbf16, #tpu.memory_space<vmem>>, %arg3: memref<1x32xf32, #tpu.memory_space<vmem>>, %arg4: memref<336x32xbf16, #tpu.memory_space<vmem>>) attributes {dimension_semantics = [#tpu.dimension_semantics<parallel>], iteration_bounds = array<i64: 1>, scalar_prefetch = 0 : i64, scratch_operands = 0 : i64, tpu.core_type = #tpu.core_type<tc>, window_params = [{transform_indices = @transform_0, window_bounds = array<i64: 336, 5>}, {pipeline_mode = #tpu.pipeline_mode<synchronous>, transform_indices = @transform_1, window_bounds = array<i64: 5, 32>}, {pipeline_mode = #tpu.pipeline_mode<synchronous>, transform_indices = @transform_2, window_bounds = array<i64: 1, 32>}, {transform_indices = @transform_3, window_bounds = array<i64: 336, 32>}]} {
    %c0 = arith.constant 0 : index
    %c0_0 = arith.constant 0 : index
    %0 = vector.load %arg1[%c0, %c0_0] : memref<336x5xbf16, #tpu.memory_space<vmem>>, vector<336x5xbf16>
    %c0_1 = arith.constant 0 : index
    %c0_2 = arith.constant 0 : index
    %1 = vector.load %arg2[%c0_1, %c0_2] : memref<5x32xbf16, #tpu.memory_space<vmem>>, vector<5x32xbf16>
    %cst = arith.constant dense<0.000000e+00> : vector<336x32xf32>
    %2 = tpu.matmul %0, %1, %cst {dimension_numbers = #tpu.dot_dimension_numbers<[1], [0], [0], [1], [0, 0, 1, 1], [], []>} : vector<336x5xbf16>, vector<5x32xbf16>, vector<336x32xf32> -> vector<336x32xf32>
    %c0_3 = arith.constant 0 : index
    %c0_4 = arith.constant 0 : index
    %3 = vector.load %arg3[%c0_3, %c0_4] : memref<1x32xf32, #tpu.memory_space<vmem>>, vector<1x32xf32>
    %4 = vector.broadcast %3 : vector<1x32xf32> to vector<336x32xf32>
    %5 = arith.addf %2, %4 : vector<336x32xf32>
    %cst_5 = arith.constant 0.000000e+00 : f32
    %6 = vector.broadcast %cst_5 : f32 to vector<336x32xf32>
    %7 = arith.cmpf oge, %5, %6 : vector<336x32xf32>
    %cst_6 = arith.constant 0.00999999977 : f32
    %8 = vector.broadcast %cst_6 : f32 to vector<336x32xf32>
    %9 = arith.mulf %8, %5 : vector<336x32xf32>
    %10 = arith.select %7, %5, %9 : vector<336x32xi1>, vector<336x32xf32>
    %11 = arith.truncf %10 : vector<336x32xf32> to vector<336x32xbf16>
    %c0_7 = arith.constant 0 : index
    %c0_8 = arith.constant 0 : index
    %12 = vector.load %arg4[%c0_7, %c0_8] : memref<336x32xbf16, #tpu.memory_space<vmem>>, vector<336x32xbf16>
    tpu.vector_store %arg4[%c0_7, %c0_8], %11 {strides = array<i32>} : memref<336x32xbf16, #tpu.memory_space<vmem>>, vector<336x32xbf16>,
    return
  }
  func.func @transform_0(%arg0: i32) -> (i32, i32) {
    %c0_i32 = arith.constant 0 : i32
    %c0_i32_0 = arith.constant 0 : i32
    return %arg0, %c0_i32 : i32, i32
  }
  func.func @transform_1(%arg0: i32) -> (i32, i32) {
    %c0_i32 = arith.constant 0 : i32
    %c0_i32_0 = arith.constant 0 : i32
    %c0_i32_1 = arith.constant 0 : i32
    return %c0_i32, %c0_i32_0 : i32, i32
  }
  func.func @transform_2(%arg0: i32) -> (i32, i32) {
    %c0_i32 = arith.constant 0 : i32
    %c0_i32_0 = arith.constant 0 : i32
    %c0_i32_1 = arith.constant 0 : i32
    return %c0_i32, %c0_i32_0 : i32, i32
  }
  func.func @transform_3(%arg0: i32) -> (i32, i32) {
    %c0_i32 = arith.constant 0 : i32
    %c0_i32_0 = arith.constant 0 : i32
    return %arg0, %c0_i32 : i32, i32
  }
}

module attributes {stable_mosaic.version = 11 : i64} {
  func.func @_matmul_bias_act_kernel(%arg0: i32, %arg1: memref<112x160xbf16, #tpu.memory_space<vmem>>, %arg2: memref<160x128xbf16, #tpu.memory_space<vmem>>, %arg3: memref<1x128xf32, #tpu.memory_space<vmem>>, %arg4: memref<112x128xbf16, #tpu.memory_space<vmem>>) attributes {dimension_semantics = [#tpu.dimension_semantics<parallel>], iteration_bounds = array<i64: 1>, scalar_prefetch = 0 : i64, scratch_operands = 0 : i64, tpu.core_type = #tpu.core_type<tc>, window_params = [{transform_indices = @transform_0, window_bounds = array<i64: 112, 160>}, {pipeline_mode = #tpu.pipeline_mode<synchronous>, transform_indices = @transform_1, window_bounds = array<i64: 160, 128>}, {pipeline_mode = #tpu.pipeline_mode<synchronous>, transform_indices = @transform_2, window_bounds = array<i64: 1, 128>}, {transform_indices = @transform_3, window_bounds = array<i64: 112, 128>}]} {
    %c0 = arith.constant 0 : index
    %c0_0 = arith.constant 0 : index
    %0 = vector.load %arg1[%c0, %c0_0] : memref<112x160xbf16, #tpu.memory_space<vmem>>, vector<112x160xbf16>
    %c0_1 = arith.constant 0 : index
    %c0_2 = arith.constant 0 : index
    %1 = vector.load %arg2[%c0_1, %c0_2] : memref<160x128xbf16, #tpu.memory_space<vmem>>, vector<160x128xbf16>
    %cst = arith.constant dense<0.000000e+00> : vector<112x128xf32>
    %2 = tpu.matmul %0, %1, %cst {dimension_numbers = #tpu.dot_dimension_numbers<[1], [0], [0], [1], [0, 0, 1, 1], [], []>} : vector<112x160xbf16>, vector<160x128xbf16>, vector<112x128xf32> -> vector<112x128xf32>
    %c0_3 = arith.constant 0 : index
    %c0_4 = arith.constant 0 : index
    %3 = vector.load %arg3[%c0_3, %c0_4] : memref<1x128xf32, #tpu.memory_space<vmem>>, vector<1x128xf32>
    %4 = vector.broadcast %3 : vector<1x128xf32> to vector<112x128xf32>
    %5 = arith.addf %2, %4 : vector<112x128xf32>
    %cst_5 = arith.constant 0.000000e+00 : f32
    %6 = vector.broadcast %cst_5 : f32 to vector<112x128xf32>
    %7 = arith.cmpf oge, %5, %6 : vector<112x128xf32>
    %cst_6 = arith.constant 0.00999999977 : f32
    %8 = vector.broadcast %cst_6 : f32 to vector<112x128xf32>
    %9 = arith.mulf %8, %5 : vector<112x128xf32>
    %10 = arith.select %7, %5, %9 : vector<112x128xi1>, vector<112x128xf32>
    %11 = arith.truncf %10 : vector<112x128xf32> to vector<112x128xbf16>
    %c0_7 = arith.constant 0 : index
    %c0_8 = arith.constant 0 : index
    %12 = vector.load %arg4[%c0_7, %c0_8] : memref<112x128xbf16, #tpu.memory_space<vmem>>, vector<112x128xbf16>
    tpu.vector_store %arg4[%c0_7, %c0_8], %11 {strides = array<i32>} : memref<112x128xbf16, #tpu.memory_space<vmem>>, vector<112x128xbf16>,
    return
  }
  func.func @transform_0(%arg0: i32) -> (i32, i32) {
    %c0_i32 = arith.constant 0 : i32
    %c0_i32_0 = arith.constant 0 : i32
    return %arg0, %c0_i32 : i32, i32
  }
  func.func @transform_1(%arg0: i32) -> (i32, i32) {
    %c0_i32 = arith.constant 0 : i32
    %c0_i32_0 = arith.constant 0 : i32
    %c0_i32_1 = arith.constant 0 : i32
    return %c0_i32, %c0_i32_0 : i32, i32
  }
  func.func @transform_2(%arg0: i32) -> (i32, i32) {
    %c0_i32 = arith.constant 0 : i32
    %c0_i32_0 = arith.constant 0 : i32
    %c0_i32_1 = arith.constant 0 : i32
    return %c0_i32, %c0_i32_0 : i32, i32
  }
  func.func @transform_3(%arg0: i32) -> (i32, i32) {
    %c0_i32 = arith.constant 0 : i32
    %c0_i32_0 = arith.constant 0 : i32
    return %arg0, %c0_i32 : i32, i32
  }
}

module attributes {stable_mosaic.version = 11 : i64} {
  func.func @_matmul_bias_act_kernel(%arg0: i32, %arg1: memref<48x640xbf16, #tpu.memory_space<vmem>>, %arg2: memref<640x256xbf16, #tpu.memory_space<vmem>>, %arg3: memref<1x256xf32, #tpu.memory_space<vmem>>, %arg4: memref<48x256xbf16, #tpu.memory_space<vmem>>) attributes {dimension_semantics = [#tpu.dimension_semantics<parallel>], iteration_bounds = array<i64: 1>, scalar_prefetch = 0 : i64, scratch_operands = 0 : i64, tpu.core_type = #tpu.core_type<tc>, window_params = [{transform_indices = @transform_0, window_bounds = array<i64: 48, 640>}, {pipeline_mode = #tpu.pipeline_mode<synchronous>, transform_indices = @transform_1, window_bounds = array<i64: 640, 256>}, {pipeline_mode = #tpu.pipeline_mode<synchronous>, transform_indices = @transform_2, window_bounds = array<i64: 1, 256>}, {transform_indices = @transform_3, window_bounds = array<i64: 48, 256>}]} {
    %c0 = arith.constant 0 : index
    %c0_0 = arith.constant 0 : index
    %0 = vector.load %arg1[%c0, %c0_0] : memref<48x640xbf16, #tpu.memory_space<vmem>>, vector<48x640xbf16>
    %c0_1 = arith.constant 0 : index
    %c0_2 = arith.constant 0 : index
    %1 = vector.load %arg2[%c0_1, %c0_2] : memref<640x256xbf16, #tpu.memory_space<vmem>>, vector<640x256xbf16>
    %cst = arith.constant dense<0.000000e+00> : vector<48x256xf32>
    %2 = tpu.matmul %0, %1, %cst {dimension_numbers = #tpu.dot_dimension_numbers<[1], [0], [0], [1], [0, 0, 1, 1], [], []>} : vector<48x640xbf16>, vector<640x256xbf16>, vector<48x256xf32> -> vector<48x256xf32>
    %c0_3 = arith.constant 0 : index
    %c0_4 = arith.constant 0 : index
    %3 = vector.load %arg3[%c0_3, %c0_4] : memref<1x256xf32, #tpu.memory_space<vmem>>, vector<1x256xf32>
    %4 = vector.broadcast %3 : vector<1x256xf32> to vector<48x256xf32>
    %5 = arith.addf %2, %4 : vector<48x256xf32>
    %cst_5 = arith.constant 0.000000e+00 : f32
    %6 = vector.broadcast %cst_5 : f32 to vector<48x256xf32>
    %7 = arith.cmpf oge, %5, %6 : vector<48x256xf32>
    %cst_6 = arith.constant 0.00999999977 : f32
    %8 = vector.broadcast %cst_6 : f32 to vector<48x256xf32>
    %9 = arith.mulf %8, %5 : vector<48x256xf32>
    %10 = arith.select %7, %5, %9 : vector<48x256xi1>, vector<48x256xf32>
    %11 = arith.truncf %10 : vector<48x256xf32> to vector<48x256xbf16>
    %c0_7 = arith.constant 0 : index
    %c0_8 = arith.constant 0 : index
    %12 = vector.load %arg4[%c0_7, %c0_8] : memref<48x256xbf16, #tpu.memory_space<vmem>>, vector<48x256xbf16>
    tpu.vector_store %arg4[%c0_7, %c0_8], %11 {strides = array<i32>} : memref<48x256xbf16, #tpu.memory_space<vmem>>, vector<48x256xbf16>,
    return
  }
  func.func @transform_0(%arg0: i32) -> (i32, i32) {
    %c0_i32 = arith.constant 0 : i32
    %c0_i32_0 = arith.constant 0 : i32
    return %arg0, %c0_i32 : i32, i32
  }
  func.func @transform_1(%arg0: i32) -> (i32, i32) {
    %c0_i32 = arith.constant 0 : i32
    %c0_i32_0 = arith.constant 0 : i32
    %c0_i32_1 = arith.constant 0 : i32
    return %c0_i32, %c0_i32_0 : i32, i32
  }
  func.func @transform_2(%arg0: i32) -> (i32, i32) {
    %c0_i32 = arith.constant 0 : i32
    %c0_i32_0 = arith.constant 0 : i32
    %c0_i32_1 = arith.constant 0 : i32
    return %c0_i32, %c0_i32_0 : i32, i32
  }
  func.func @transform_3(%arg0: i32) -> (i32, i32) {
    %c0_i32 = arith.constant 0 : i32
    %c0_i32_0 = arith.constant 0 : i32
    return %arg0, %c0_i32 : i32, i32
  }
}

module attributes {stable_mosaic.version = 11 : i64} {
  func.func @_matmul_bias_act_kernel(%arg0: i32, %arg1: memref<16x1280xbf16, #tpu.memory_space<vmem>>, %arg2: memref<1280x256xbf16, #tpu.memory_space<vmem>>, %arg3: memref<1x256xf32, #tpu.memory_space<vmem>>, %arg4: memref<16x256xbf16, #tpu.memory_space<vmem>>) attributes {dimension_semantics = [#tpu.dimension_semantics<parallel>], iteration_bounds = array<i64: 1>, scalar_prefetch = 0 : i64, scratch_operands = 0 : i64, tpu.core_type = #tpu.core_type<tc>, window_params = [{transform_indices = @transform_0, window_bounds = array<i64: 16, 1280>}, {pipeline_mode = #tpu.pipeline_mode<synchronous>, transform_indices = @transform_1, window_bounds = array<i64: 1280, 256>}, {pipeline_mode = #tpu.pipeline_mode<synchronous>, transform_indices = @transform_2, window_bounds = array<i64: 1, 256>}, {transform_indices = @transform_3, window_bounds = array<i64: 16, 256>}]} {
    %c0 = arith.constant 0 : index
    %c0_0 = arith.constant 0 : index
    %0 = vector.load %arg1[%c0, %c0_0] : memref<16x1280xbf16, #tpu.memory_space<vmem>>, vector<16x1280xbf16>
    %c0_1 = arith.constant 0 : index
    %c0_2 = arith.constant 0 : index
    %1 = vector.load %arg2[%c0_1, %c0_2] : memref<1280x256xbf16, #tpu.memory_space<vmem>>, vector<1280x256xbf16>
    %cst = arith.constant dense<0.000000e+00> : vector<16x256xf32>
    %2 = tpu.matmul %0, %1, %cst {dimension_numbers = #tpu.dot_dimension_numbers<[1], [0], [0], [1], [0, 0, 1, 1], [], []>} : vector<16x1280xbf16>, vector<1280x256xbf16>, vector<16x256xf32> -> vector<16x256xf32>
    %c0_3 = arith.constant 0 : index
    %c0_4 = arith.constant 0 : index
    %3 = vector.load %arg3[%c0_3, %c0_4] : memref<1x256xf32, #tpu.memory_space<vmem>>, vector<1x256xf32>
    %4 = vector.broadcast %3 : vector<1x256xf32> to vector<16x256xf32>
    %5 = arith.addf %2, %4 : vector<16x256xf32>
    %cst_5 = arith.constant 0.000000e+00 : f32
    %6 = vector.broadcast %cst_5 : f32 to vector<16x256xf32>
    %7 = arith.cmpf oge, %5, %6 : vector<16x256xf32>
    %cst_6 = arith.constant 0.00999999977 : f32
    %8 = vector.broadcast %cst_6 : f32 to vector<16x256xf32>
    %9 = arith.mulf %8, %5 : vector<16x256xf32>
    %10 = arith.select %7, %5, %9 : vector<16x256xi1>, vector<16x256xf32>
    %11 = arith.truncf %10 : vector<16x256xf32> to vector<16x256xbf16>
    %c0_7 = arith.constant 0 : index
    %c0_8 = arith.constant 0 : index
    %12 = vector.load %arg4[%c0_7, %c0_8] : memref<16x256xbf16, #tpu.memory_space<vmem>>, vector<16x256xbf16>
    tpu.vector_store %arg4[%c0_7, %c0_8], %11 {strides = array<i32>} : memref<16x256xbf16, #tpu.memory_space<vmem>>, vector<16x256xbf16>,
    return
  }
  func.func @transform_0(%arg0: i32) -> (i32, i32) {
    %c0_i32 = arith.constant 0 : i32
    %c0_i32_0 = arith.constant 0 : i32
    return %arg0, %c0_i32 : i32, i32
  }
  func.func @transform_1(%arg0: i32) -> (i32, i32) {
    %c0_i32 = arith.constant 0 : i32
    %c0_i32_0 = arith.constant 0 : i32
    %c0_i32_1 = arith.constant 0 : i32
    return %c0_i32, %c0_i32_0 : i32, i32
  }
  func.func @transform_2(%arg0: i32) -> (i32, i32) {
    %c0_i32 = arith.constant 0 : i32
    %c0_i32_0 = arith.constant 0 : i32
    %c0_i32_1 = arith.constant 0 : i32
    return %c0_i32, %c0_i32_0 : i32, i32
  }
  func.func @transform_3(%arg0: i32) -> (i32, i32) {
    %c0_i32 = arith.constant 0 : i32
    %c0_i32_0 = arith.constant 0 : i32
    return %arg0, %c0_i32 : i32, i32
  }
}

module attributes {stable_mosaic.version = 11 : i64} {
  func.func @_matmul_bias_act_kernel(%arg0: i32, %arg1: memref<16x768xbf16, #tpu.memory_space<vmem>>, %arg2: memref<768x128xbf16, #tpu.memory_space<vmem>>, %arg3: memref<1x128xf32, #tpu.memory_space<vmem>>, %arg4: memref<16x128xf32, #tpu.memory_space<vmem>>) attributes {dimension_semantics = [#tpu.dimension_semantics<parallel>], iteration_bounds = array<i64: 1>, scalar_prefetch = 0 : i64, scratch_operands = 0 : i64, tpu.core_type = #tpu.core_type<tc>, window_params = [{transform_indices = @transform_0, window_bounds = array<i64: 16, 768>}, {pipeline_mode = #tpu.pipeline_mode<synchronous>, transform_indices = @transform_1, window_bounds = array<i64: 768, 128>}, {pipeline_mode = #tpu.pipeline_mode<synchronous>, transform_indices = @transform_2, window_bounds = array<i64: 1, 128>}, {transform_indices = @transform_3, window_bounds = array<i64: 16, 128>}]} {
    %c0 = arith.constant 0 : index
    %c0_0 = arith.constant 0 : index
    %0 = vector.load %arg1[%c0, %c0_0] : memref<16x768xbf16, #tpu.memory_space<vmem>>, vector<16x768xbf16>
    %c0_1 = arith.constant 0 : index
    %c0_2 = arith.constant 0 : index
    %1 = vector.load %arg2[%c0_1, %c0_2] : memref<768x128xbf16, #tpu.memory_space<vmem>>, vector<768x128xbf16>
    %cst = arith.constant dense<0.000000e+00> : vector<16x128xf32>
    %2 = tpu.matmul %0, %1, %cst {dimension_numbers = #tpu.dot_dimension_numbers<[1], [0], [0], [1], [0, 0, 1, 1], [], []>} : vector<16x768xbf16>, vector<768x128xbf16>, vector<16x128xf32> -> vector<16x128xf32>
    %c0_3 = arith.constant 0 : index
    %c0_4 = arith.constant 0 : index
    %3 = vector.load %arg3[%c0_3, %c0_4] : memref<1x128xf32, #tpu.memory_space<vmem>>, vector<1x128xf32>
    %4 = vector.broadcast %3 : vector<1x128xf32> to vector<16x128xf32>
    %5 = arith.addf %2, %4 : vector<16x128xf32>
    %c0_5 = arith.constant 0 : index
    %c0_6 = arith.constant 0 : index
    %6 = vector.load %arg4[%c0_5, %c0_6] : memref<16x128xf32, #tpu.memory_space<vmem>>, vector<16x128xf32>
    tpu.vector_store %arg4[%c0_5, %c0_6], %5 {strides = array<i32>} : memref<16x128xf32, #tpu.memory_space<vmem>>, vector<16x128xf32>,
    return
  }
  func.func @transform_0(%arg0: i32) -> (i32, i32) {
    %c0_i32 = arith.constant 0 : i32
    %c0_i32_0 = arith.constant 0 : i32
    return %arg0, %c0_i32 : i32, i32
  }
  func.func @transform_1(%arg0: i32) -> (i32, i32) {
    %c0_i32 = arith.constant 0 : i32
    %c0_i32_0 = arith.constant 0 : i32
    %c0_i32_1 = arith.constant 0 : i32
    return %c0_i32, %c0_i32_0 : i32, i32
  }
  func.func @transform_2(%arg0: i32) -> (i32, i32) {
    %c0_i32 = arith.constant 0 : i32
    %c0_i32_0 = arith.constant 0 : i32
    %c0_i32_1 = arith.constant 0 : i32
    return %c0_i32, %c0_i32_0 : i32, i32
  }
  func.func @transform_3(%arg0: i32) -> (i32, i32) {
    %c0_i32 = arith.constant 0 : i32
    %c0_i32_0 = arith.constant 0 : i32
    return %arg0, %c0_i32 : i32, i32
  }
}

</mosaic_0001>

<bundles_post_ra>
// kernel: submpd_forward.5
= control target key start
LH: loop header
LB: loop body
LE: loop exit
PB: predicated region body
PF: predicated region fallthrough
CT: control target
= control target key end

     0   :  { %8 = vsyncpa [#allocation3], 0  ;;  %s1082_s12 = smov [#allocation2]   ;;  %s1461_s0 = inlined_call_operand.vmem [shape: bf16[336,5], index: 0, kind: input, shape index: {}]   ;;  %s1462_s1 = inlined_call_operand.vmem [shape: bf16[5,32], index: 1, kind: input, shape index: {}]   ;;  %s1463_s2 = inlined_call_operand.hbm [shape: f32[1,32], index: 2, kind: input, shape index: {}]   ;;  %s1464_s3 = inlined_call_operand.vmem [shape: bf16[336,32], index: 3, kind: output, shape index: {}]  }
   0x1   :  { %s19_s13 = sshll.u32 %s1082_s12, 4  ;;  %s1058_s16 = scalar_lea.hbm %s1463_s2, 16  ;;  %s20_s13 = int_to_ptr.vmem [resolvable:$true] %s19_s13 }
   0x2   :  { %p1059_p0 = scmp.ne.s32.totalorder %s1463_s2, %s1058_s16  ;;  %p1062_p1 = scmp.lt.u32.totalorder %s1058_s16, %s1463_s2 }
   0x4   :  { %p1064_p2 = pnand %p1062_p1, %p1059_p0 }
   0x6   :  { %1067 = shalt.err (!%p1064_p2)
}
   0x7   :  { %s1068_s21 = scalar_lea.vmem %s20_s13, 16  ;;  %s1072_s22 = scalar_lea.vmem %s20_s13, 32 }
   0x8   :  { %p1069_p3 = scmp.ne.s32.totalorder %s20_s13, %s1068_s21  ;;  %p1073_p4 = scmp.lt.s32.totalorder %s20_s13, %s20_s13 }
   0x9   :  { %p1074_p5 = scmp.lt.s32.totalorder %s1072_s22, %s1068_s21 }
   0xb   :  { %p1075_p6 = por %p1074_p5, %p1073_p4 }
   0xd   :  { %p1076_p7 = pnand %p1075_p6, %p1069_p3 }
   0xf   :  { %1079 = shalt.err (!%p1076_p7)
}
  0x10   :  { %22 = dma.hbm_to_vmem [thread:$0]  %s1463_s2, 16, %s20_s13, [#allocation3]  }
  0x11   :  { %1080 = dma.done.wait [#allocation3], 16  }
  0x12   :  { %1081 = vsyncadd [#allocation3], 4294967280  ;;  %vm246_vm0 = vcmask 1041408   ;;  %v1083_v0 = vmov 0.0   ;;  %vm247_vm1 = vcmask 1042432   ;;  %v1084_v1 = vmov 65535  }
  0x13   :  { %945 = vmatprep.subr.bf16.mxu0 %v1083_v0  ;;  %1031 = vmatprep.subr.bf16.mxu1 %v1083_v0  ;;  %v248_v2 = vsel %vm246_vm0, 4294967295, %v1084_v1  ;;  %vm1085_vm2 = vmmov 0   ;;  %v69_v4 = vld [vmem:[%s1462_s1] sm:$0x7]  ;;  %v1038_v7 = vld [vmem:[%s1461_s0 + $0x58] sm:$0xff]   ;;  %vm182_vm3 = vcmask 39936  }
  0x14   :  { %947 = vmatprep.mubr.msk.bf16.mxu0 %vm1085_vm2, %v1083_v0  ;;  %991 = vmatprep.mubr.msk.bf16.mxu1 %vm1085_vm2, %v1083_v0  ;;  %v249_v3 = vsel %vm247_vm1, %v248_v2, 0  ;;  %v1037_v6 = vld [vmem:[%s1461_s0] sm:$0xff]   ;;  %v1039_v8 = vld [vmem:[%s1461_s0 + $0x8] sm:$0xff]   ;;  %v1041_v10 = vld [vmem:[%s1461_s0 + $0x10] sm:$0xff]   ;;  %vm748_vm6 = vcmask 257024  }
  0x15   :  { %v251_v5 = vand.u32 %v249_v3, %v69_v4  ;;  %v1040_v9 = vld [vmem:[%s1461_s0 + $0x60] sm:$0xff]   ;;  %v1042_v11 = vld [vmem:[%s1461_s0 + $0x68] sm:$0xff]   ;;  %v1043_v12 = vld [vmem:[%s1461_s0 + $0x18] sm:$0xff]  }
  0x16   :  { %v1044_v13 = vld [vmem:[%s1461_s0 + $0x70] sm:$0xff]   ;;  %v1045_v14 = vld [vmem:[%s1461_s0 + $0x20] sm:$0xff]   ;;  %v1046_v15 = vld [vmem:[%s1461_s0 + $0x78] sm:$0xff]  }
  0x17   :  { %946 = vmatpush3.bf16.msra.mxu0 %v251_v5  ;;  %1032 = vmatpush3.bf16.msra.mxu1 %v251_v5  ;;  %v1047_v16 = vld [vmem:[%s1461_s0 + $0x28] sm:$0xff]   ;;  %v1048_v17 = vld [vmem:[%s1461_s0 + $0x80] sm:$0xff]   ;;  %v1049_v18 = vld [vmem:[%s1461_s0 + $0x30] sm:$0xff]  }
  0x18   :  { %v1050_v19 = vld [vmem:[%s1461_s0 + $0x88] sm:$0xff]   ;;  %v1051_v20 = vld [vmem:[%s1461_s0 + $0x38] sm:$0xff]   ;;  %v1052_v21 = vld [vmem:[%s1461_s0 + $0x90] sm:$0xff]  }
  0x19   :  { %v1053_v22 = vld [vmem:[%s1461_s0 + $0x40] sm:$0xff]   ;;  %v1054_v23 = vld [vmem:[%s1461_s0 + $0x98] sm:$0xff]   ;;  %v1055_v24 = vld [vmem:[%s1461_s0 + $0x48] sm:$0xff]  }
  0x1a   :  { %948 = vmatmul.mubr.msk.bf16.vlgmr.msra.gmra.mrb[0].mxu0 %vm182_vm3, %v1037_v6  ;;  %992 = vmatmul.mubr.msk.bf16.vlgmr.msra.gmra.mrb[0].mxu1 %vm182_vm3, %v1038_v7  ;;  %v1056_v25 = vld [vmem:[%s1461_s0 + $0xa0] sm:$0xff]   ;;  %v1057_v26 = vld [vmem:[%s1461_s0 + $0x50] sm:$0xff]  }
  0x1b   :  { %951 = vmatprep.mubr.msk.bf16.mxu0 %vm1085_vm2, %v1083_v0  ;;  %995 = vmatprep.mubr.msk.bf16.mxu1 %vm1085_vm2, %v1083_v0  ;;  %v1249_v27 = vld [vmem:[#allocation2] ss:$0 sm:$0xff] }
  0x22   :  { %952 = vmatmul.mubr.msk.bf16.gmra.mrb[4].mxu0 %vm182_vm3, %v1039_v8  ;;  %996 = vmatmul.mubr.msk.bf16.gmra.mrb[4].mxu1 %vm182_vm3, %v1040_v9 }
  0x23   :  { %955 = vmatprep.mubr.msk.bf16.mxu0 %vm1085_vm2, %v1083_v0  ;;  %999 = vmatprep.mubr.msk.bf16.mxu1 %vm1085_vm2, %v1083_v0 }
  0x2a   :  { %956 = vmatmul.mubr.msk.bf16.gmra.mrb[8].mxu0 %vm182_vm3, %v1041_v10  ;;  %1000 = vmatmul.mubr.msk.bf16.gmra.mrb[8].mxu1 %vm182_vm3, %v1042_v11 }
  0x2b   :  { %959 = vmatprep.mubr.msk.bf16.mxu0 %vm1085_vm2, %v1083_v0  ;;  %1003 = vmatprep.mubr.msk.bf16.mxu1 %vm1085_vm2, %v1083_v0 }
  0x32   :  { %960 = vmatmul.mubr.msk.bf16.gmra.mrb[12].mxu0 %vm182_vm3, %v1043_v12  ;;  %1004 = vmatmul.mubr.msk.bf16.gmra.mrb[12].mxu1 %vm182_vm3, %v1044_v13 }
  0x33   :  { %963 = vmatprep.mubr.msk.bf16.mxu0 %vm1085_vm2, %v1083_v0  ;;  %1007 = vmatprep.mubr.msk.bf16.mxu1 %vm1085_vm2, %v1083_v0 }
  0x3a   :  { %964 = vmatmul.mubr.msk.bf16.gmra.mrb[16].mxu0 %vm182_vm3, %v1045_v14  ;;  %1008 = vmatmul.mubr.msk.bf16.gmra.mrb[16].mxu1 %vm182_vm3, %v1046_v15 }
  0x3b   :  { %967 = vmatprep.mubr.msk.bf16.mxu0 %vm1085_vm2, %v1083_v0  ;;  %1011 = vmatprep.mubr.msk.bf16.mxu1 %vm1085_vm2, %v1083_v0 }
  0x42   :  { %968 = vmatmul.mubr.msk.bf16.gmra.mrb[20].mxu0 %vm182_vm3, %v1047_v16  ;;  %1012 = vmatmul.mubr.msk.bf16.gmra.mrb[20].mxu1 %vm182_vm3, %v1048_v17 }
  0x43   :  { %971 = vmatprep.mubr.msk.bf16.mxu0 %vm1085_vm2, %v1083_v0  ;;  %1015 = vmatprep.mubr.msk.bf16.mxu1 %vm1085_vm2, %v1083_v0 }
  0x4a   :  { %972 = vmatmul.mubr.msk.bf16.gmra.mrb[24].mxu0 %vm182_vm3, %v1049_v18  ;;  %1016 = vmatmul.mubr.msk.bf16.gmra.mrb[24].mxu1 %vm182_vm3, %v1050_v19 }
  0x4b   :  { %975 = vmatprep.mubr.msk.bf16.mxu0 %vm1085_vm2, %v1083_v0  ;;  %1019 = vmatprep.mubr.msk.bf16.mxu1 %vm1085_vm2, %v1083_v0 }
  0x52   :  { %976 = vmatmul.mubr.msk.bf16.gmra.mrb[28].mxu0 %vm182_vm3, %v1051_v20  ;;  %1020 = vmatmul.mubr.msk.bf16.gmra.mrb[28].mxu1 %vm182_vm3, %v1052_v21 }
  0x53   :  { %979 = vmatprep.mubr.msk.bf16.mxu0 %vm1085_vm2, %v1083_v0  ;;  %1023 = vmatprep.mubr.msk.bf16.mxu1 %vm1085_vm2, %v1083_v0 }
  0x5a   :  { %980 = vmatmul.mubr.msk.bf16.gmra.mrb[32].mxu0 %vm182_vm3, %v1053_v22  ;;  %1024 = vmatmul.mubr.msk.bf16.gmra.mrb[32].mxu1 %vm182_vm3, %v1054_v23 }
  0x5b   :  { %983 = vmatprep.mubr.msk.bf16.mxu0 %vm1085_vm2, %v1083_v0  ;;  %1027 = vmatprep.mubr.msk.bf16.mxu1 %vm1085_vm2, %v1083_v0 }
  0x62   :  { %984 = vmatmul.mubr.msk.bf16.gmra.mrb[36].mxu0 %vm182_vm3, %v1055_v24  ;;  %1028 = vmatmul.mubr.msk.bf16.gmra.mrb[36].mxu1 %vm182_vm3, %v1056_v25 }
  0x63   :  { %987 = vmatprep.mubr.msk.bf16.mxu0 %vm1085_vm2, %v1083_v0 }
  0x6a   :  { %988 = vmatmul.mubr.msk.bf16.gmra.mrb[40].mxu0 %vm182_vm3, %v1057_v26 }
  0xed   :  { %v287_v28 = vpop.f32.mrb[0].mxu0  ;;  %v375_v29 = vpop.f32.mrb[0].mxu1 }
  0xee   :  { %v288_v30 = vadd.f32 %v1249_v27, %v287_v28  ;;  %v949_v31 = vpop.f32.mrb[1].mxu0  ;;  %v376_v32 = vadd.f32 %v1249_v27, %v375_v29  ;;  %v993_v33 = vpop.f32.mrb[1].mxu1 }
  0xef   :  { %v290_v34 = vpop.f32.mrb[2].mxu0  ;;  %v378_v35 = vpop.f32.mrb[2].mxu1 }
  0xf0   :  { %vm454_vm4 = vcmp.ge.f32.partialorder %v288_v30, 0.0  ;;  %v496_v36 = vmul.f32 0.01, %v288_v30  ;;  %v291_v37 = vadd.f32 %v1249_v27, %v290_v34  ;;  %v950_v38 = vpop.f32.mrb[3].mxu0  ;;  %vm476_vm5 = vcmp.ge.f32.partialorder %v376_v32, 0.0  ;;  %v994_v39 = vpop.f32.mrb[3].mxu1 }
  0xf1   :  { %v518_v40 = vmul.f32 0.01, %v376_v32  ;;  %v379_v41 = vadd.f32 %v1249_v27, %v378_v35 }
  0xf2   :  { %v538_v42 = vsel %vm454_vm4, %v288_v30, %v496_v36  ;;  %vm455_vm7 = vcmp.ge.f32.partialorder %v291_v37, 0.0  ;;  %v497_v43 = vmul.f32 0.01, %v291_v37 }
  0xf3   :  { %v881_v44 = vpack.c.bf16 %v538_v42, %v538_v42  ;;  %v560_v45 = vsel %vm476_vm5, %v376_v32, %v518_v40  ;;  %vm477_vm8 = vcmp.ge.f32.partialorder %v379_v41, 0.0  ;;  %v519_v46 = vmul.f32 0.01, %v379_v41 }
  0xf4   :  { %v539_v47 = vsel %vm455_vm7, %v291_v37, %v497_v43  ;;  %v903_v48 = vpack.c.bf16 %v560_v45, %v560_v45 }
  0xf5   :  { %749 = vst.msk [vmem:[%s1464_s3] sm:$0xf] %vm748_vm6, %v881_v44  ;;  %v882_v49 = vpack.c.bf16 %v539_v47, %v539_v47  ;;  %v561_v50 = vsel %vm477_vm8, %v379_v41, %v519_v46  ;;  %v295_v51 = vpop.f32.mrb[4].mxu0  ;;  %v383_v52 = vpop.f32.mrb[4].mxu1 }
  0xf6   :  { %771 = vst.msk [vmem:[%s1464_s3 + $0x58] sm:$0xf] %vm748_vm6, %v903_v48  ;;  %v904_v53 = vpack.c.bf16 %v561_v50, %v561_v50  ;;  %v296_v54 = vadd.f32 %v1249_v27, %v295_v51  ;;  %v953_v55 = vpop.f32.mrb[5].mxu0  ;;  %v384_v56 = vadd.f32 %v1249_v27, %v383_v52  ;;  %v997_v57 = vpop.f32.mrb[5].mxu1 }
  0xf7   :  { %750 = vst.msk [vmem:[%s1464_s3 + $0x4] sm:$0xf] %vm748_vm6, %v882_v49  ;;  %v298_v58 = vpop.f32.mrb[6].mxu0  ;;  %v386_v59 = vpop.f32.mrb[6].mxu1 }
  0xf8   :  { %772 = vst.msk [vmem:[%s1464_s3 + $0x5c] sm:$0xf] %vm748_vm6, %v904_v53  ;;  %vm456_vm9 = vcmp.ge.f32.partialorder %v296_v54, 0.0  ;;  %v498_v60 = vmul.f32 0.01, %v296_v54  ;;  %v299_v61 = vadd.f32 %v1249_v27, %v298_v58  ;;  %v954_v62 = vpop.f32.mrb[7].mxu0  ;;  %v387_v1 = vadd.f32 %v1249_v27, %v386_v59 }
  0xf9   :  { %vm478_vm10 = vcmp.ge.f32.partialorder %v384_v56, 0.0  ;;  %v998_v63 = vpop.f32.mrb[7].mxu1  ;;  %v520_v0 = vmul.f32 0.01, %v384_v56 }
  0xfa   :  { %v540_v2 = vsel %vm456_vm9, %v296_v54, %v498_v60  ;;  %vm457_vm11 = vcmp.ge.f32.partialorder %v299_v61, 0.0  ;;  %v499_v3 = vmul.f32 0.01, %v299_v61  ;;  %vm479_vm12 = vcmp.ge.f32.partialorder %v387_v1, 0.0 }
  0xfb   :  { %v883_v4 = vpack.c.bf16 %v540_v2, %v540_v2  ;;  %v562_v5 = vsel %vm478_vm10, %v384_v56, %v520_v0  ;;  %v521_v6 = vmul.f32 0.01, %v387_v1 }
  0xfc   :  { %v541_v7 = vsel %vm457_vm11, %v299_v61, %v499_v3  ;;  %v905_v8 = vpack.c.bf16 %v562_v5, %v562_v5 }
  0xfd   :  { %751 = vst.msk [vmem:[%s1464_s3 + $0x8] sm:$0xf] %vm748_vm6, %v883_v4  ;;  %v884_v9 = vpack.c.bf16 %v541_v7, %v541_v7  ;;  %v563_v10 = vsel %vm479_vm12, %v387_v1, %v521_v6  ;;  %v303_v11 = vpop.f32.mrb[8].mxu0  ;;  %v391_v12 = vpop.f32.mrb[8].mxu1 }
  0xfe   :  { %773 = vst.msk [vmem:[%s1464_s3 + $0x60] sm:$0xf] %vm748_vm6, %v905_v8  ;;  %v906_v13 = vpack.c.bf16 %v563_v10, %v563_v10  ;;  %v304_v14 = vadd.f32 %v1249_v27, %v303_v11  ;;  %v957_v15 = vpop.f32.mrb[9].mxu0  ;;  %v392_v16 = vadd.f32 %v1249_v27, %v391_v12  ;;  %v1001_v17 = vpop.f32.mrb[9].mxu1 }
  0xff   :  { %752 = vst.msk [vmem:[%s1464_s3 + $0xc] sm:$0xf] %vm748_vm6, %v884_v9  ;;  %v306_v18 = vpop.f32.mrb[10].mxu0  ;;  %v394_v19 = vpop.f32.mrb[10].mxu1 }
 0x100   :  { %774 = vst.msk [vmem:[%s1464_s3 + $0x64] sm:$0xf] %vm748_vm6, %v906_v13  ;;  %vm458_vm13 = vcmp.ge.f32.partialorder %v304_v14, 0.0  ;;  %v500_v20 = vmul.f32 0.01, %v304_v14  ;;  %v307_v21 = vadd.f32 %v1249_v27, %v306_v18  ;;  %v958_v22 = vpop.f32.mrb[11].mxu0  ;;  %v395_v25 = vadd.f32 %v1249_v27, %v394_v19 }
 0x101   :  { %vm480_vm14 = vcmp.ge.f32.partialorder %v392_v16, 0.0  ;;  %v1002_v23 = vpop.f32.mrb[11].mxu1  ;;  %v522_v24 = vmul.f32 0.01, %v392_v16 }
 0x102   :  { %v542_v26 = vsel %vm458_vm13, %v304_v14, %v500_v20  ;;  %vm459_vm15 = vcmp.ge.f32.partialorder %v307_v21, 0.0  ;;  %v501_v28 = vmul.f32 0.01, %v307_v21  ;;  %vm481_vm0 = vcmp.ge.f32.partialorder %v395_v25, 0.0 }
 0x103   :  { %v885_v29 = vpack.c.bf16 %v542_v26, %v542_v26  ;;  %v564_v30 = vsel %vm480_vm14, %v392_v16, %v522_v24  ;;  %v523_v31 = vmul.f32 0.01, %v395_v25 }
 0x104   :  { %v543_v32 = vsel %vm459_vm15, %v307_v21, %v501_v28  ;;  %v907_v33 = vpack.c.bf16 %v564_v30, %v564_v30 }
 0x105   :  { %753 = vst.msk [vmem:[%s1464_s3 + $0x10] sm:$0xf] %vm748_vm6, %v885_v29  ;;  %v886_v34 = vpack.c.bf16 %v543_v32, %v543_v32  ;;  %v565_v35 = vsel %vm481_vm0, %v395_v25, %v523_v31  ;;  %v311_v36 = vpop.f32.mrb[12].mxu0  ;;  %v399_v37 = vpop.f32.mrb[12].mxu1 }
 0x106   :  { %775 = vst.msk [vmem:[%s1464_s3 + $0x68] sm:$0xf] %vm748_vm6, %v907_v33  ;;  %v908_v38 = vpack.c.bf16 %v565_v35, %v565_v35  ;;  %v312_v39 = vadd.f32 %v1249_v27, %v311_v36  ;;  %v961_v40 = vpop.f32.mrb[13].mxu0  ;;  %v400_v41 = vadd.f32 %v1249_v27, %v399_v37  ;;  %v1005_v42 = vpop.f32.mrb[13].mxu1 }
 0x107   :  { %754 = vst.msk [vmem:[%s1464_s3 + $0x14] sm:$0xf] %vm748_vm6, %v886_v34  ;;  %v314_v43 = vpop.f32.mrb[14].mxu0  ;;  %v402_v44 = vpop.f32.mrb[14].mxu1 }
 0x108   :  { %776 = vst.msk [vmem:[%s1464_s3 + $0x6c] sm:$0xf] %vm748_vm6, %v908_v38  ;;  %vm460_vm1 = vcmp.ge.f32.partialorder %v312_v39, 0.0  ;;  %v502_v45 = vmul.f32 0.01, %v312_v39  ;;  %v315_v46 = vadd.f32 %v1249_v27, %v314_v43  ;;  %v962_v47 = vpop.f32.mrb[15].mxu0  ;;  %v403_v50 = vadd.f32 %v1249_v27, %v402_v44 }
 0x109   :  { %vm482_vm2 = vcmp.ge.f32.partialorder %v400_v41, 0.0  ;;  %v1006_v48 = vpop.f32.mrb[15].mxu1  ;;  %v524_v49 = vmul.f32 0.01, %v400_v41 }
 0x10a   :  { %v544_v51 = vsel %vm460_vm1, %v312_v39, %v502_v45  ;;  %vm461_vm3 = vcmp.ge.f32.partialorder %v315_v46, 0.0  ;;  %v503_v52 = vmul.f32 0.01, %v315_v46  ;;  %vm483_vm4 = vcmp.ge.f32.partialorder %v403_v50, 0.0 }
 0x10b   :  { %v887_v53 = vpack.c.bf16 %v544_v51, %v544_v51  ;;  %v566_v54 = vsel %vm482_vm2, %v400_v41, %v524_v49  ;;  %v525_v55 = vmul.f32 0.01, %v403_v50 }
 0x10c   :  { %v545_v56 = vsel %vm461_vm3, %v315_v46, %v503_v52  ;;  %v909_v57 = vpack.c.bf16 %v566_v54, %v566_v54 }
 0x10d   :  { %755 = vst.msk [vmem:[%s1464_s3 + $0x18] sm:$0xf] %vm748_vm6, %v887_v53  ;;  %v888_v58 = vpack.c.bf16 %v545_v56, %v545_v56  ;;  %v567_v59 = vsel %vm483_vm4, %v403_v50, %v525_v55  ;;  %v319_v60 = vpop.f32.mrb[16].mxu0  ;;  %v407_v61 = vpop.f32.mrb[16].mxu1 }
 0x10e   :  { %777 = vst.msk [vmem:[%s1464_s3 + $0x70] sm:$0xf] %vm748_vm6, %v909_v57  ;;  %v910_v62 = vpack.c.bf16 %v567_v59, %v567_v59  ;;  %v320_v63 = vadd.f32 %v1249_v27, %v319_v60  ;;  %v965_v0 = vpop.f32.mrb[17].mxu0  ;;  %v408_v1 = vadd.f32 %v1249_v27, %v407_v61  ;;  %v1009_v2 = vpop.f32.mrb[17].mxu1 }
 0x10f   :  { %756 = vst.msk [vmem:[%s1464_s3 + $0x1c] sm:$0xf] %vm748_vm6, %v888_v58  ;;  %v322_v3 = vpop.f32.mrb[18].mxu0  ;;  %v410_v4 = vpop.f32.mrb[18].mxu1 }
 0x110   :  { %778 = vst.msk [vmem:[%s1464_s3 + $0x74] sm:$0xf] %vm748_vm6, %v910_v62  ;;  %vm462_vm5 = vcmp.ge.f32.partialorder %v320_v63, 0.0  ;;  %v504_v5 = vmul.f32 0.01, %v320_v63  ;;  %v323_v6 = vadd.f32 %v1249_v27, %v322_v3  ;;  %v966_v7 = vpop.f32.mrb[19].mxu0  ;;  %v411_v10 = vadd.f32 %v1249_v27, %v410_v4 }
 0x111   :  { %vm484_vm7 = vcmp.ge.f32.partialorder %v408_v1, 0.0  ;;  %v1010_v8 = vpop.f32.mrb[19].mxu1  ;;  %v526_v9 = vmul.f32 0.01, %v408_v1 }
 0x112   :  { %v546_v11 = vsel %vm462_vm5, %v320_v63, %v504_v5  ;;  %vm463_vm8 = vcmp.ge.f32.partialorder %v323_v6, 0.0  ;;  %v505_v12 = vmul.f32 0.01, %v323_v6  ;;  %vm485_vm9 = vcmp.ge.f32.partialorder %v411_v10, 0.0 }
 0x113   :  { %v889_v13 = vpack.c.bf16 %v546_v11, %v546_v11  ;;  %v568_v14 = vsel %vm484_vm7, %v408_v1, %v526_v9  ;;  %v527_v15 = vmul.f32 0.01, %v411_v10 }
 0x114   :  { %v547_v16 = vsel %vm463_vm8, %v323_v6, %v505_v12  ;;  %v911_v17 = vpack.c.bf16 %v568_v14, %v568_v14 }
 0x115   :  { %757 = vst.msk [vmem:[%s1464_s3 + $0x20] sm:$0xf] %vm748_vm6, %v889_v13  ;;  %v890_v18 = vpack.c.bf16 %v547_v16, %v547_v16  ;;  %v569_v19 = vsel %vm485_vm9, %v411_v10, %v527_v15  ;;  %v327_v20 = vpop.f32.mrb[20].mxu0  ;;  %v415_v21 = vpop.f32.mrb[20].mxu1 }
 0x116   :  { %779 = vst.msk [vmem:[%s1464_s3 + $0x78] sm:$0xf] %vm748_vm6, %v911_v17  ;;  %v912_v22 = vpack.c.bf16 %v569_v19, %v569_v19  ;;  %v328_v23 = vadd.f32 %v1249_v27, %v327_v20  ;;  %v969_v24 = vpop.f32.mrb[21].mxu0  ;;  %v416_v25 = vadd.f32 %v1249_v27, %v415_v21  ;;  %v1013_v26 = vpop.f32.mrb[21].mxu1 }
 0x117   :  { %758 = vst.msk [vmem:[%s1464_s3 + $0x24] sm:$0xf] %vm748_vm6, %v890_v18  ;;  %v330_v28 = vpop.f32.mrb[22].mxu0  ;;  %v418_v29 = vpop.f32.mrb[22].mxu1 }
 0x118   :  { %780 = vst.msk [vmem:[%s1464_s3 + $0x7c] sm:$0xf] %vm748_vm6, %v912_v22  ;;  %vm464_vm10 = vcmp.ge.f32.partialorder %v328_v23, 0.0  ;;  %v506_v30 = vmul.f32 0.01, %v328_v23  ;;  %v331_v31 = vadd.f32 %v1249_v27, %v330_v28  ;;  %v970_v32 = vpop.f32.mrb[23].mxu0  ;;  %v419_v35 = vadd.f32 %v1249_v27, %v418_v29 }
 0x119   :  { %vm486_vm11 = vcmp.ge.f32.partialorder %v416_v25, 0.0  ;;  %v1014_v33 = vpop.f32.mrb[23].mxu1  ;;  %v528_v34 = vmul.f32 0.01, %v416_v25 }
 0x11a   :  { %v548_v36 = vsel %vm464_vm10, %v328_v23, %v506_v30  ;;  %vm465_vm12 = vcmp.ge.f32.partialorder %v331_v31, 0.0  ;;  %v507_v37 = vmul.f32 0.01, %v331_v31  ;;  %vm487_vm13 = vcmp.ge.f32.partialorder %v419_v35, 0.0 }
 0x11b   :  { %v891_v38 = vpack.c.bf16 %v548_v36, %v548_v36  ;;  %v570_v39 = vsel %vm486_vm11, %v416_v25, %v528_v34  ;;  %v529_v40 = vmul.f32 0.01, %v419_v35 }
 0x11c   :  { %v549_v41 = vsel %vm465_vm12, %v331_v31, %v507_v37  ;;  %v913_v42 = vpack.c.bf16 %v570_v39, %v570_v39 }
 0x11d   :  { %759 = vst.msk [vmem:[%s1464_s3 + $0x28] sm:$0xf] %vm748_vm6, %v891_v38  ;;  %v892_v43 = vpack.c.bf16 %v549_v41, %v549_v41  ;;  %v571_v44 = vsel %vm487_vm13, %v419_v35, %v529_v40  ;;  %v335_v45 = vpop.f32.mrb[24].mxu0  ;;  %v423_v46 = vpop.f32.mrb[24].mxu1 }
 0x11e   :  { %781 = vst.msk [vmem:[%s1464_s3 + $0x80] sm:$0xf] %vm748_vm6, %v913_v42  ;;  %v914_v47 = vpack.c.bf16 %v571_v44, %v571_v44  ;;  %v336_v48 = vadd.f32 %v1249_v27, %v335_v45  ;;  %v973_v49 = vpop.f32.mrb[25].mxu0  ;;  %v424_v50 = vadd.f32 %v1249_v27, %v423_v46  ;;  %v1017_v51 = vpop.f32.mrb[25].mxu1 }
 0x11f   :  { %760 = vst.msk [vmem:[%s1464_s3 + $0x2c] sm:$0xf] %vm748_vm6, %v892_v43  ;;  %v338_v52 = vpop.f32.mrb[26].mxu0  ;;  %v426_v53 = vpop.f32.mrb[26].mxu1 }
 0x120   :  { %782 = vst.msk [vmem:[%s1464_s3 + $0x84] sm:$0xf] %vm748_vm6, %v914_v47  ;;  %vm466_vm14 = vcmp.ge.f32.partialorder %v336_v48, 0.0  ;;  %v508_v54 = vmul.f32 0.01, %v336_v48  ;;  %v339_v55 = vadd.f32 %v1249_v27, %v338_v52  ;;  %v974_v56 = vpop.f32.mrb[27].mxu0  ;;  %v427_v59 = vadd.f32 %v1249_v27, %v426_v53 }
 0x121   :  { %vm488_vm15 = vcmp.ge.f32.partialorder %v424_v50, 0.0  ;;  %v1018_v57 = vpop.f32.mrb[27].mxu1  ;;  %v530_v58 = vmul.f32 0.01, %v424_v50 }
 0x122   :  { %v550_v60 = vsel %vm466_vm14, %v336_v48, %v508_v54  ;;  %vm467_vm0 = vcmp.ge.f32.partialorder %v339_v55, 0.0  ;;  %v509_v61 = vmul.f32 0.01, %v339_v55  ;;  %vm489_vm1 = vcmp.ge.f32.partialorder %v427_v59, 0.0 }
 0x123   :  { %v893_v62 = vpack.c.bf16 %v550_v60, %v550_v60  ;;  %v572_v63 = vsel %vm488_vm15, %v424_v50, %v530_v58  ;;  %v531_v0 = vmul.f32 0.01, %v427_v59 }
 0x124   :  { %v551_v1 = vsel %vm467_vm0, %v339_v55, %v509_v61  ;;  %v915_v2 = vpack.c.bf16 %v572_v63, %v572_v63 }
 0x125   :  { %761 = vst.msk [vmem:[%s1464_s3 + $0x30] sm:$0xf] %vm748_vm6, %v893_v62  ;;  %v894_v3 = vpack.c.bf16 %v551_v1, %v551_v1  ;;  %v573_v4 = vsel %vm489_vm1, %v427_v59, %v531_v0  ;;  %v343_v5 = vpop.f32.mrb[28].mxu0  ;;  %v431_v6 = vpop.f32.mrb[28].mxu1 }
 0x126   :  { %783 = vst.msk [vmem:[%s1464_s3 + $0x88] sm:$0xf] %vm748_vm6, %v915_v2  ;;  %v916_v7 = vpack.c.bf16 %v573_v4, %v573_v4  ;;  %v344_v8 = vadd.f32 %v1249_v27, %v343_v5  ;;  %v977_v9 = vpop.f32.mrb[29].mxu0  ;;  %v432_v10 = vadd.f32 %v1249_v27, %v431_v6  ;;  %v1021_v11 = vpop.f32.mrb[29].mxu1 }
 0x127   :  { %762 = vst.msk [vmem:[%s1464_s3 + $0x34] sm:$0xf] %vm748_vm6, %v894_v3  ;;  %v346_v12 = vpop.f32.mrb[30].mxu0  ;;  %v434_v13 = vpop.f32.mrb[30].mxu1 }
 0x128   :  { %784 = vst.msk [vmem:[%s1464_s3 + $0x8c] sm:$0xf] %vm748_vm6, %v916_v7  ;;  %vm468_vm2 = vcmp.ge.f32.partialorder %v344_v8, 0.0  ;;  %v510_v14 = vmul.f32 0.01, %v344_v8  ;;  %v347_v15 = vadd.f32 %v1249_v27, %v346_v12  ;;  %v978_v16 = vpop.f32.mrb[31].mxu0  ;;  %v435_v19 = vadd.f32 %v1249_v27, %v434_v13 }
 0x129   :  { %vm490_vm3 = vcmp.ge.f32.partialorder %v432_v10, 0.0  ;;  %v1022_v17 = vpop.f32.mrb[31].mxu1  ;;  %v532_v18 = vmul.f32 0.01, %v432_v10 }
 0x12a   :  { %v552_v20 = vsel %vm468_vm2, %v344_v8, %v510_v14  ;;  %vm469_vm4 = vcmp.ge.f32.partialorder %v347_v15, 0.0  ;;  %v511_v21 = vmul.f32 0.01, %v347_v15  ;;  %vm491_vm5 = vcmp.ge.f32.partialorder %v435_v19, 0.0 }
 0x12b   :  { %v895_v22 = vpack.c.bf16 %v552_v20, %v552_v20  ;;  %v574_v23 = vsel %vm490_vm3, %v432_v10, %v532_v18  ;;  %v533_v24 = vmul.f32 0.01, %v435_v19 }
 0x12c   :  { %v553_v25 = vsel %vm469_vm4, %v347_v15, %v511_v21  ;;  %v917_v26 = vpack.c.bf16 %v574_v23, %v574_v23 }
 0x12d   :  { %763 = vst.msk [vmem:[%s1464_s3 + $0x38] sm:$0xf] %vm748_vm6, %v895_v22  ;;  %v896_v28 = vpack.c.bf16 %v553_v25, %v553_v25  ;;  %v575_v29 = vsel %vm491_vm5, %v435_v19, %v533_v24  ;;  %v351_v30 = vpop.f32.mrb[32].mxu0  ;;  %v439_v31 = vpop.f32.mrb[32].mxu1 }
 0x12e   :  { %785 = vst.msk [vmem:[%s1464_s3 + $0x90] sm:$0xf] %vm748_vm6, %v917_v26  ;;  %v918_v32 = vpack.c.bf16 %v575_v29, %v575_v29  ;;  %v352_v33 = vadd.f32 %v1249_v27, %v351_v30  ;;  %v981_v34 = vpop.f32.mrb[33].mxu0  ;;  %v440_v35 = vadd.f32 %v1249_v27, %v439_v31  ;;  %v1025_v36 = vpop.f32.mrb[33].mxu1 }
 0x12f   :  { %764 = vst.msk [vmem:[%s1464_s3 + $0x3c] sm:$0xf] %vm748_vm6, %v896_v28  ;;  %v354_v37 = vpop.f32.mrb[34].mxu0  ;;  %v442_v38 = vpop.f32.mrb[34].mxu1 }
 0x130   :  { %786 = vst.msk [vmem:[%s1464_s3 + $0x94] sm:$0xf] %vm748_vm6, %v918_v32  ;;  %vm470_vm7 = vcmp.ge.f32.partialorder %v352_v33, 0.0  ;;  %v512_v39 = vmul.f32 0.01, %v352_v33  ;;  %v355_v40 = vadd.f32 %v1249_v27, %v354_v37  ;;  %v982_v41 = vpop.f32.mrb[35].mxu0  ;;  %v443_v44 = vadd.f32 %v1249_v27, %v442_v38 }
 0x131   :  { %vm492_vm8 = vcmp.ge.f32.partialorder %v440_v35, 0.0  ;;  %v1026_v42 = vpop.f32.mrb[35].mxu1  ;;  %v534_v43 = vmul.f32 0.01, %v440_v35 }
 0x132   :  { %v554_v45 = vsel %vm470_vm7, %v352_v33, %v512_v39  ;;  %vm471_vm9 = vcmp.ge.f32.partialorder %v355_v40, 0.0  ;;  %v513_v46 = vmul.f32 0.01, %v355_v40  ;;  %vm493_vm10 = vcmp.ge.f32.partialorder %v443_v44, 0.0 }
 0x133   :  { %v897_v47 = vpack.c.bf16 %v554_v45, %v554_v45  ;;  %v576_v48 = vsel %vm492_vm8, %v440_v35, %v534_v43  ;;  %v535_v49 = vmul.f32 0.01, %v443_v44 }
 0x134   :  { %v555_v50 = vsel %vm471_vm9, %v355_v40, %v513_v46  ;;  %v919_v51 = vpack.c.bf16 %v576_v48, %v576_v48 }
 0x135   :  { %765 = vst.msk [vmem:[%s1464_s3 + $0x40] sm:$0xf] %vm748_vm6, %v897_v47  ;;  %v898_v52 = vpack.c.bf16 %v555_v50, %v555_v50  ;;  %v577_v53 = vsel %vm493_vm10, %v443_v44, %v535_v49  ;;  %v359_v54 = vpop.f32.mrb[36].mxu0  ;;  %v447_v55 = vpop.f32.mrb[36].mxu1 }
 0x136   :  { %787 = vst.msk [vmem:[%s1464_s3 + $0x98] sm:$0xf] %vm748_vm6, %v919_v51  ;;  %v920_v56 = vpack.c.bf16 %v577_v53, %v577_v53  ;;  %v360_v57 = vadd.f32 %v1249_v27, %v359_v54  ;;  %v985_v58 = vpop.f32.mrb[37].mxu0  ;;  %v448_v59 = vadd.f32 %v1249_v27, %v447_v55  ;;  %v1029_v60 = vpop.f32.mrb[37].mxu1 }
 0x137   :  { %766 = vst.msk [vmem:[%s1464_s3 + $0x44] sm:$0xf] %vm748_vm6, %v898_v52  ;;  %v362_v61 = vpop.f32.mrb[38].mxu0  ;;  %v450_v62 = vpop.f32.mrb[38].mxu1 }
 0x138   :  { %788 = vst.msk [vmem:[%s1464_s3 + $0x9c] sm:$0xf] %vm748_vm6, %v920_v56  ;;  %vm472_vm11 = vcmp.ge.f32.partialorder %v360_v57, 0.0  ;;  %v514_v63 = vmul.f32 0.01, %v360_v57  ;;  %v363_v0 = vadd.f32 %v1249_v27, %v362_v61  ;;  %v986_v1 = vpop.f32.mrb[39].mxu0  ;;  %v451_v4 = vadd.f32 %v1249_v27, %v450_v62 }
 0x139   :  { %vm494_vm12 = vcmp.ge.f32.partialorder %v448_v59, 0.0  ;;  %v1030_v2 = vpop.f32.mrb[39].mxu1  ;;  %v536_v3 = vmul.f32 0.01, %v448_v59 }
 0x13a   :  { %v556_v5 = vsel %vm472_vm11, %v360_v57, %v514_v63  ;;  %vm473_vm13 = vcmp.ge.f32.partialorder %v363_v0, 0.0  ;;  %v515_v6 = vmul.f32 0.01, %v363_v0  ;;  %vm495_vm14 = vcmp.ge.f32.partialorder %v451_v4, 0.0 }
 0x13b   :  { %v899_v7 = vpack.c.bf16 %v556_v5, %v556_v5  ;;  %v578_v8 = vsel %vm494_vm12, %v448_v59, %v536_v3  ;;  %v537_v9 = vmul.f32 0.01, %v451_v4 }
 0x13c   :  { %v557_v10 = vsel %vm473_vm13, %v363_v0, %v515_v6  ;;  %v921_v11 = vpack.c.bf16 %v578_v8, %v578_v8 }
 0x13d   :  { %767 = vst.msk [vmem:[%s1464_s3 + $0x48] sm:$0xf] %vm748_vm6, %v899_v7  ;;  %v900_v12 = vpack.c.bf16 %v557_v10, %v557_v10  ;;  %v579_v13 = vsel %vm495_vm14, %v451_v4, %v537_v9  ;;  %v367_v14 = vpop.f32.mrb[40].mxu0 }
 0x13e   :  { %789 = vst.msk [vmem:[%s1464_s3 + $0xa0] sm:$0xf] %vm748_vm6, %v921_v11  ;;  %v922_v15 = vpack.c.bf16 %v579_v13, %v579_v13  ;;  %v368_v16 = vadd.f32 %v1249_v27, %v367_v14  ;;  %v989_v17 = vpop.f32.mrb[41].mxu0 }
 0x13f   :  { %768 = vst.msk [vmem:[%s1464_s3 + $0x4c] sm:$0xf] %vm748_vm6, %v900_v12  ;;  %v370_v18 = vpop.f32.mrb[42].mxu0 }
 0x140   :  { %790 = vst.msk [vmem:[%s1464_s3 + $0xa4] sm:$0xf] %vm748_vm6, %v922_v15  ;;  %vm474_vm15 = vcmp.ge.f32.partialorder %v368_v16, 0.0  ;;  %v516_v19 = vmul.f32 0.01, %v368_v16  ;;  %v371_v20 = vadd.f32 %v1249_v27, %v370_v18  ;;  %v990_v21 = vpop.f32.mrb[43].mxu0 }
 0x142   :  { %v558_v22 = vsel %vm474_vm15, %v368_v16, %v516_v19  ;;  %vm475_vm0 = vcmp.ge.f32.partialorder %v371_v20, 0.0  ;;  %v517_v23 = vmul.f32 0.01, %v371_v20 }
 0x143   :  { %v901_v24 = vpack.c.bf16 %v558_v22, %v558_v22 }
 0x144   :  { %v559_v25 = vsel %vm475_vm0, %v371_v20, %v517_v23 }
 0x145   :  { %769 = vst.msk [vmem:[%s1464_s3 + $0x50] sm:$0xf] %vm748_vm6, %v901_v24  ;;  %v902_v26 = vpack.c.bf16 %v559_v25, %v559_v25 }
 0x147   :  { %770 = vst.msk [vmem:[%s1464_s3 + $0x54] sm:$0xf] %vm748_vm6, %v902_v26 }
 0x148   :  { %795 = vsyncpa [#allocation3], 1 }

// kernel: submpd_forward.6
= control target key start
LH: loop header
LB: loop body
LE: loop exit
PB: predicated region body
PF: predicated region fallthrough
CT: control target
= control target key end

     0   :  { %v559_v0 = vmov 0   ;;  %vm179_vm0 = vcmask 261120   ;;  %s699_s1 = inlined_call_operand.vmem [shape: bf16[160,128], index: 1, kind: input, shape index: {}]   ;;  %s700_s0 = inlined_call_operand.vmem [shape: bf16[112,160], index: 0, kind: input, shape index: {}]   ;;  %s701_s2 = inlined_call_operand.vmem [shape: f32[1,128], index: 2, kind: input, shape index: {}]   ;;  %s702_s3 = inlined_call_operand.vmem [shape: bf16[112,128], index: 3, kind: output, shape index: {}]  }
   0x1   :  { %201 = vmatprep.subr.bf16.mxu0 %v559_v0  ;;  %v528_v1 = vld [vmem:[%s699_s1] sm:$0xff]   ;;  %507 = vmatprep.subr.bf16.mxu1 %v559_v0  ;;  %v529_v2 = vld [vmem:[%s699_s1 + $0x8] sm:$0xff]   ;;  %v530_v3 = vld [vmem:[%s699_s1 + $0x10] sm:$0xff]  }
   0x2   :  { %202 = vmatpush1.bf16.msra.mxu0 %v528_v1  ;;  %517 = vmatpush1.bf16.msra.mxu1 %v528_v1  ;;  %v531_v4 = vld [vmem:[%s699_s1 + $0x18] sm:$0xff]   ;;  %v540_v5 = vld [vmem:[%s700_s0 + $0x4] ss:$8 sps:$4 sm:$0xff]   ;;  %v534_v9 = vld [vmem:[%s699_s1 + $0x30] sm:$0xff]  }
   0x3   :  { %203 = vmatprep.subr.bf16.mxu0 %v559_v0  ;;  %508 = vmatprep.subr.bf16.mxu1 %v559_v0  ;;  %v543_v6 = vld [vmem:[%s700_s0 + $0x44] ss:$8 sps:$4 sm:$0xff]   ;;  %v535_v10 = vld [vmem:[%s699_s1 + $0x38] sm:$0xff]   ;;  %v538_v13 = vld [vmem:[%s700_s0] ss:$8 sps:$4 sm:$0xff]  }
   0x4   :  { %431 = vmatprep.mubr.msk.bf16.mxu0 %vm179_vm0, %v540_v5  ;;  %v532_v7 = vld [vmem:[%s699_s1 + $0x20] sm:$0xff]   ;;  %435 = vmatprep.mubr.msk.bf16.mxu1 %vm179_vm0, %v543_v6  ;;  %v533_v8 = vld [vmem:[%s699_s1 + $0x28] sm:$0xff]   ;;  %v544_v15 = vld [vmem:[%s700_s0 + $0x14] ss:$8 sps:$4 sm:$0xff]  }
   0x5   :  { %v536_v11 = vld [vmem:[%s699_s1 + $0x40] sm:$0xff]   ;;  %v537_v12 = vld [vmem:[%s699_s1 + $0x48] sm:$0xff]   ;;  %v547_v16 = vld [vmem:[%s700_s0 + $0x54] ss:$8 sps:$4 sm:$0xff]  }
   0x6   :  { %204 = vmatpush1.bf16.msra.mxu0 %v529_v2  ;;  %518 = vmatpush1.bf16.msra.mxu1 %v529_v2  ;;  %v541_v14 = vld [vmem:[%s700_s0 + $0x40] ss:$8 sps:$4 sm:$0xff]   ;;  %v546_v17 = vld [vmem:[%s700_s0 + $0x10] ss:$8 sps:$4 sm:$0xff]   ;;  %v550_v19 = vld [vmem:[%s700_s0 + $0x24] ss:$8 sps:$4 sm:$0xff]  }
   0x7   :  { %205 = vmatprep.subr.bf16.mxu0 %v559_v0  ;;  %509 = vmatprep.subr.bf16.mxu1 %v559_v0  ;;  %v549_v18 = vld [vmem:[%s700_s0 + $0x50] ss:$8 sps:$4 sm:$0xff]   ;;  %v553_v20 = vld [vmem:[%s700_s0 + $0x64] ss:$8 sps:$4 sm:$0xff]   ;;  %v552_v21 = vld [vmem:[%s700_s0 + $0x20] ss:$8 sps:$4 sm:$0xff]  }
   0x8   :  { %v555_v22 = vld [vmem:[%s700_s0 + $0x60] ss:$8 sps:$4 sm:$0xff]   ;;  %v556_v23 = vld [vmem:[%s700_s0 + $0x34] ss:$8 sps:$4 sm:$0xff]   ;;  %v558_v24 = vld [vmem:[%s700_s0 + $0x30] ss:$8 sps:$4 sm:$0xff]  }
   0x9   :  { %v662_v25 = vld [vmem:[%s701_s2] ss:$0 sm:$0xff] }
   0xa   :  { %206 = vmatpush1.bf16.msra.mxu0 %v530_v3  ;;  %519 = vmatpush1.bf16.msra.mxu1 %v530_v3 }
   0xb   :  { %207 = vmatprep.subr.bf16.mxu0 %v559_v0  ;;  %510 = vmatprep.subr.bf16.mxu1 %v559_v0 }
   0xe   :  { %208 = vmatpush1.bf16.msra.mxu0 %v531_v4  ;;  %520 = vmatpush1.bf16.msra.mxu1 %v531_v4 }
   0xf   :  { %209 = vmatprep.subr.bf16.mxu0 %v559_v0  ;;  %511 = vmatprep.subr.bf16.mxu1 %v559_v0 }
  0x12   :  { %210 = vmatpush1.bf16.msra.mxu0 %v532_v7  ;;  %521 = vmatpush1.bf16.msra.mxu1 %v532_v7 }
  0x13   :  { %211 = vmatprep.subr.bf16.mxu0 %v559_v0  ;;  %512 = vmatprep.subr.bf16.mxu1 %v559_v0 }
  0x16   :  { %212 = vmatpush1.bf16.msra.mxu0 %v533_v8  ;;  %522 = vmatpush1.bf16.msra.mxu1 %v533_v8 }
  0x17   :  { %213 = vmatprep.subr.bf16.mxu0 %v559_v0  ;;  %513 = vmatprep.subr.bf16.mxu1 %v559_v0 }
  0x1a   :  { %214 = vmatpush1.bf16.msra.mxu0 %v534_v9  ;;  %523 = vmatpush1.bf16.msra.mxu1 %v534_v9 }
  0x1b   :  { %215 = vmatprep.subr.bf16.mxu0 %v559_v0  ;;  %514 = vmatprep.subr.bf16.mxu1 %v559_v0 }
  0x1e   :  { %216 = vmatpush1.bf16.msra.mxu0 %v535_v10  ;;  %524 = vmatpush1.bf16.msra.mxu1 %v535_v10 }
  0x1f   :  { %217 = vmatprep.subr.bf16.mxu0 %v559_v0  ;;  %515 = vmatprep.subr.bf16.mxu1 %v559_v0 }
  0x22   :  { %218 = vmatpush1.bf16.msra.mxu0 %v536_v11  ;;  %525 = vmatpush1.bf16.msra.mxu1 %v536_v11 }
  0x23   :  { %219 = vmatprep.subr.bf16.mxu0 %v559_v0  ;;  %516 = vmatprep.subr.bf16.mxu1 %v559_v0 }
  0x26   :  { %220 = vmatpush1.bf16.msra.mxu0 %v537_v12  ;;  %526 = vmatpush1.bf16.msra.mxu1 %v537_v12 }
  0x29   :  { %234 = vmatmul.mubr.bf16.vlgmr.msra.gmra.mrb[0].mxu0 %v538_v13  ;;  %266 = vmatmul.mubr.bf16.vlgmr.msra.gmra.mrb[0].mxu1 %v541_v14 }
  0x2a   :  { %432 = vmatprep.mubr.msk.bf16.mxu0 %vm179_vm0, %v544_v15  ;;  %436 = vmatprep.mubr.msk.bf16.mxu1 %vm179_vm0, %v547_v16 }
  0x31   :  { %242 = vmatmul.mubr.bf16.gmra.mrb[4].mxu0 %v546_v17  ;;  %274 = vmatmul.mubr.bf16.gmra.mrb[4].mxu1 %v549_v18 }
  0x32   :  { %433 = vmatprep.mubr.msk.bf16.mxu0 %vm179_vm0, %v550_v19  ;;  %437 = vmatprep.mubr.msk.bf16.mxu1 %vm179_vm0, %v553_v20 }
  0x39   :  { %250 = vmatmul.mubr.bf16.gmra.mrb[8].mxu0 %v552_v21  ;;  %282 = vmatmul.mubr.bf16.gmra.mrb[8].mxu1 %v555_v22 }
  0x3a   :  { %434 = vmatprep.mubr.msk.bf16.mxu0 %vm179_vm0, %v556_v23 }
  0x41   :  { %258 = vmatmul.mubr.bf16.gmra.mrb[12].mxu0 %v558_v24 }
  0xfc   :  { %v235_v26 = vpop.f32.mrb[0].mxu0  ;;  %v267_v27 = vpop.f32.mrb[0].mxu1 }
  0xfd   :  { %v236_v28 = vadd.f32 %v662_v25, %v235_v26  ;;  %v237_v29 = vpop.f32.mrb[1].mxu0  ;;  %v268_v30 = vadd.f32 %v662_v25, %v267_v27  ;;  %v269_v31 = vpop.f32.mrb[1].mxu1 }
  0xfe   :  { %v238_v32 = vpop.f32.mrb[2].mxu0  ;;  %v270_v33 = vpop.f32.mrb[2].mxu1 }
  0xff   :  { %v304_v34 = vmul.f32 0.01, %v236_v28  ;;  %v239_v35 = vadd.f32 %v662_v25, %v238_v32  ;;  %v240_v36 = vpop.f32.mrb[3].mxu0  ;;  %vm298_vm1 = vcmp.ge.f32.partialorder %v268_v30, 0.0  ;;  %v272_v37 = vpop.f32.mrb[3].mxu1  ;;  %vm290_vm2 = vcmp.ge.f32.partialorder %v236_v28, 0.0 }
 0x100   :  { %v312_v38 = vmul.f32 0.01, %v268_v30  ;;  %v271_v39 = vadd.f32 %v662_v25, %v270_v33 }
 0x101   :  { %vm291_vm3 = vcmp.ge.f32.partialorder %v239_v35, 0.0  ;;  %v305_v40 = vmul.f32 0.01, %v239_v35  ;;  %v318_v43 = vsel %vm290_vm2, %v236_v28, %v304_v34 }
 0x102   :  { %v326_v41 = vsel %vm298_vm1, %v268_v30, %v312_v38  ;;  %vm299_vm4 = vcmp.ge.f32.partialorder %v271_v39, 0.0  ;;  %v313_v42 = vmul.f32 0.01, %v271_v39 }
 0x103   :  { %v319_v44 = vsel %vm291_vm3, %v239_v35, %v305_v40 }
 0x104   :  { %v469_v45 = vpack.c.bf16 %v319_v44, %v318_v43  ;;  %v327_v46 = vsel %vm299_vm4, %v271_v39, %v313_v42  ;;  %v243_v47 = vpop.f32.mrb[4].mxu0  ;;  %v275_v48 = vpop.f32.mrb[4].mxu1 }
 0x105   :  { %v489_v49 = vpack.c.bf16 %v327_v46, %v326_v41  ;;  %v244_v50 = vadd.f32 %v662_v25, %v243_v47  ;;  %v245_v51 = vpop.f32.mrb[5].mxu0  ;;  %v276_v52 = vadd.f32 %v662_v25, %v275_v48  ;;  %v277_v53 = vpop.f32.mrb[5].mxu1 }
 0x106   :  { %470 = vst [vmem:[%s702_s3] sm:$0xff] %v469_v45   ;;  %v246_v54 = vpop.f32.mrb[6].mxu0  ;;  %v278_v55 = vpop.f32.mrb[6].mxu1 }
 0x107   :  { %504 = vst [vmem:[%s702_s3 + $0x20] sm:$0xff] %v489_v49   ;;  %v306_v56 = vmul.f32 0.01, %v244_v50  ;;  %v247_v57 = vadd.f32 %v662_v25, %v246_v54  ;;  %v248_v58 = vpop.f32.mrb[7].mxu0  ;;  %vm300_vm5 = vcmp.ge.f32.partialorder %v276_v52, 0.0  ;;  %v280_v59 = vpop.f32.mrb[7].mxu1  ;;  %v279_v61 = vadd.f32 %v662_v25, %v278_v55 }
 0x108   :  { %vm292_vm6 = vcmp.ge.f32.partialorder %v244_v50, 0.0  ;;  %v314_v60 = vmul.f32 0.01, %v276_v52 }
 0x109   :  { %vm293_vm7 = vcmp.ge.f32.partialorder %v247_v57, 0.0  ;;  %v307_v62 = vmul.f32 0.01, %v247_v57  ;;  %vm301_vm8 = vcmp.ge.f32.partialorder %v279_v61, 0.0  ;;  %v315_v0 = vmul.f32 0.01, %v279_v61 }
 0x10a   :  { %v328_v63 = vsel %vm300_vm5, %v276_v52, %v314_v60  ;;  %v320_v1 = vsel %vm292_vm6, %v244_v50, %v306_v56 }
 0x10b   :  { %v321_v2 = vsel %vm293_vm7, %v247_v57, %v307_v62  ;;  %v329_v4 = vsel %vm301_vm8, %v279_v61, %v315_v0 }
 0x10c   :  { %v474_v3 = vpack.c.bf16 %v321_v2, %v320_v1  ;;  %v251_v5 = vpop.f32.mrb[8].mxu0  ;;  %v283_v6 = vpop.f32.mrb[8].mxu1  ;;  %v494_v7 = vpack.c.bf16 %v329_v4, %v328_v63 }
 0x10d   :  { %v252_v8 = vadd.f32 %v662_v25, %v251_v5  ;;  %v253_v9 = vpop.f32.mrb[9].mxu0  ;;  %v284_v10 = vadd.f32 %v662_v25, %v283_v6  ;;  %v285_v11 = vpop.f32.mrb[9].mxu1 }
 0x10e   :  { %501 = vst [vmem:[%s702_s3 + $0x8] sm:$0xff] %v474_v3   ;;  %v254_v12 = vpop.f32.mrb[10].mxu0  ;;  %v286_v13 = vpop.f32.mrb[10].mxu1  ;;  %505 = vst [vmem:[%s702_s3 + $0x28] sm:$0xff] %v494_v7  }
 0x10f   :  { %v308_v14 = vmul.f32 0.01, %v252_v8  ;;  %v255_v15 = vadd.f32 %v662_v25, %v254_v12  ;;  %v256_v16 = vpop.f32.mrb[11].mxu0  ;;  %vm302_vm9 = vcmp.ge.f32.partialorder %v284_v10, 0.0  ;;  %v288_v17 = vpop.f32.mrb[11].mxu1  ;;  %vm294_vm10 = vcmp.ge.f32.partialorder %v252_v8, 0.0 }
 0x110   :  { %v316_v18 = vmul.f32 0.01, %v284_v10  ;;  %v287_v19 = vadd.f32 %v662_v25, %v286_v13 }
 0x111   :  { %vm295_vm11 = vcmp.ge.f32.partialorder %v255_v15, 0.0  ;;  %v309_v20 = vmul.f32 0.01, %v255_v15  ;;  %v322_v23 = vsel %vm294_vm10, %v252_v8, %v308_v14 }
 0x112   :  { %v330_v21 = vsel %vm302_vm9, %v284_v10, %v316_v18  ;;  %vm303_vm12 = vcmp.ge.f32.partialorder %v287_v19, 0.0  ;;  %v317_v22 = vmul.f32 0.01, %v287_v19 }
 0x113   :  { %v323_v24 = vsel %vm295_vm11, %v255_v15, %v309_v20 }
 0x114   :  { %v479_v26 = vpack.c.bf16 %v323_v24, %v322_v23  ;;  %v331_v27 = vsel %vm303_vm12, %v287_v19, %v317_v22  ;;  %v259_v28 = vpop.f32.mrb[12].mxu0 }
 0x115   :  { %v499_v29 = vpack.c.bf16 %v331_v27, %v330_v21  ;;  %v260_v30 = vadd.f32 %v662_v25, %v259_v28  ;;  %v261_v31 = vpop.f32.mrb[13].mxu0 }
 0x116   :  { %502 = vst [vmem:[%s702_s3 + $0x10] sm:$0xff] %v479_v26   ;;  %v262_v32 = vpop.f32.mrb[14].mxu0 }
 0x117   :  { %506 = vst [vmem:[%s702_s3 + $0x30] sm:$0xff] %v499_v29   ;;  %v310_v33 = vmul.f32 0.01, %v260_v30  ;;  %v263_v34 = vadd.f32 %v662_v25, %v262_v32  ;;  %v264_v35 = vpop.f32.mrb[15].mxu0  ;;  %vm296_vm13 = vcmp.ge.f32.partialorder %v260_v30, 0.0 }
 0x119   :  { %vm297_vm14 = vcmp.ge.f32.partialorder %v263_v34, 0.0  ;;  %v311_v36 = vmul.f32 0.01, %v263_v34  ;;  %v324_v37 = vsel %vm296_vm13, %v260_v30, %v310_v33 }
 0x11b   :  { %v325_v38 = vsel %vm297_vm14, %v263_v34, %v311_v36 }
 0x11c   :  { %v484_v39 = vpack.c.bf16 %v325_v38, %v324_v37 }
 0x11e   :  { %503 = vst [vmem:[%s702_s3 + $0x18] sm:$0xff] %v484_v39  }

// kernel: submpd_forward.7
= control target key start
LH: loop header
LB: loop body
LE: loop exit
PB: predicated region body
PF: predicated region fallthrough
CT: control target
= control target key end

     0   :  { %s1505_s1 = inlined_call_operand.vmem [shape: bf16[640,256], index: 1, kind: input, shape index: {}]   ;;  %s1506_s0 = inlined_call_operand.vmem [shape: bf16[48,640], index: 0, kind: input, shape index: {}]   ;;  %s1507_s2 = inlined_call_operand.vmem [shape: f32[1,256], index: 2, kind: input, shape index: {}]   ;;  %s1508_s3 = inlined_call_operand.vmem [shape: bf16[48,256], index: 3, kind: output, shape index: {}]  }
   0x1   :  { %v1034_v0 = vld [vmem:[%s1505_s1 + $0x4] ss:$8 sps:$4 sm:$0xff]   ;;  %v1038_v2 = vld [vmem:[%s1505_s1] ss:$8 sps:$4 sm:$0xff]   ;;  %v1040_v4 = vld [vmem:[%s1505_s1 + $0x14] ss:$8 sps:$4 sm:$0xff]  }
   0x2   :  { %v1036_v1 = vld [vmem:[%s1505_s1 + $0x104] ss:$8 sps:$4 sm:$0xff]   ;;  %603 = vmatprep.subr.bf16.mxu1 %v1034_v0  ;;  %v1039_v3 = vld [vmem:[%s1505_s1 + $0x100] ss:$8 sps:$4 sm:$0xff]   ;;  %v1042_v5 = vld [vmem:[%s1505_s1 + $0x114] ss:$8 sps:$4 sm:$0xff]  }
   0x3   :  { %666 = vmatprep.subr.bf16.mxu0 %v1036_v1  ;;  %604 = vmatpush1.bf16.msra.mxu1 %v1038_v2  ;;  %v1044_v6 = vld [vmem:[%s1505_s1 + $0x10] ss:$8 sps:$4 sm:$0xff]   ;;  %v1046_v8 = vld [vmem:[%s1505_s1 + $0x24] ss:$8 sps:$4 sm:$0xff]   ;;  %v1050_v10 = vld [vmem:[%s1505_s1 + $0x20] ss:$8 sps:$4 sm:$0xff]  }
   0x4   :  { %667 = vmatpush1.bf16.msra.mxu0 %v1039_v3  ;;  %605 = vmatprep.subr.bf16.mxu1 %v1040_v4  ;;  %v1045_v7 = vld [vmem:[%s1505_s1 + $0x110] ss:$8 sps:$4 sm:$0xff]   ;;  %v1048_v9 = vld [vmem:[%s1505_s1 + $0x124] ss:$8 sps:$4 sm:$0xff]   ;;  %v1051_v11 = vld [vmem:[%s1505_s1 + $0x120] ss:$8 sps:$4 sm:$0xff]  }
   0x5   :  { %668 = vmatprep.subr.bf16.mxu0 %v1042_v5  ;;  %v1052_v12 = vld [vmem:[%s1505_s1 + $0x34] ss:$8 sps:$4 sm:$0xff]   ;;  %v1056_v14 = vld [vmem:[%s1505_s1 + $0x30] ss:$8 sps:$4 sm:$0xff]   ;;  %v1058_v16 = vld [vmem:[%s1505_s1 + $0x44] ss:$8 sps:$4 sm:$0xff]  }
   0x6   :  { %v1054_v13 = vld [vmem:[%s1505_s1 + $0x134] ss:$8 sps:$4 sm:$0xff]   ;;  %v1057_v15 = vld [vmem:[%s1505_s1 + $0x130] ss:$8 sps:$4 sm:$0xff]   ;;  %v1060_v17 = vld [vmem:[%s1505_s1 + $0x144] ss:$8 sps:$4 sm:$0xff]  }
   0x7   :  { %606 = vmatpush1.bf16.msra.mxu1 %v1044_v6  ;;  %v1062_v18 = vld [vmem:[%s1505_s1 + $0x40] ss:$8 sps:$4 sm:$0xff]   ;;  %v1064_v20 = vld [vmem:[%s1505_s1 + $0x54] ss:$8 sps:$4 sm:$0xff]   ;;  %v1068_v22 = vld [vmem:[%s1505_s1 + $0x50] ss:$8 sps:$4 sm:$0xff]  }
   0x8   :  { %669 = vmatpush1.bf16.msra.mxu0 %v1045_v7  ;;  %607 = vmatprep.subr.bf16.mxu1 %v1046_v8  ;;  %v1063_v19 = vld [vmem:[%s1505_s1 + $0x140] ss:$8 sps:$4 sm:$0xff]   ;;  %v1066_v21 = vld [vmem:[%s1505_s1 + $0x154] ss:$8 sps:$4 sm:$0xff]   ;;  %v1069_v23 = vld [vmem:[%s1505_s1 + $0x150] ss:$8 sps:$4 sm:$0xff]  }
   0x9   :  { %670 = vmatprep.subr.bf16.mxu0 %v1048_v9  ;;  %v1070_v24 = vld [vmem:[%s1505_s1 + $0x64] ss:$8 sps:$4 sm:$0xff]   ;;  %v1074_v26 = vld [vmem:[%s1505_s1 + $0x60] ss:$8 sps:$4 sm:$0xff]   ;;  %v1076_v28 = vld [vmem:[%s1505_s1 + $0x74] ss:$8 sps:$4 sm:$0xff]  }
   0xa   :  { %v1072_v25 = vld [vmem:[%s1505_s1 + $0x164] ss:$8 sps:$4 sm:$0xff]   ;;  %v1075_v27 = vld [vmem:[%s1505_s1 + $0x160] ss:$8 sps:$4 sm:$0xff]   ;;  %v1078_v29 = vld [vmem:[%s1505_s1 + $0x174] ss:$8 sps:$4 sm:$0xff]  }
   0xb   :  { %608 = vmatpush1.bf16.msra.mxu1 %v1050_v10  ;;  %v1080_v30 = vld [vmem:[%s1505_s1 + $0x70] ss:$8 sps:$4 sm:$0xff]   ;;  %v1082_v32 = vld [vmem:[%s1505_s1 + $0x84] ss:$8 sps:$4 sm:$0xff]   ;;  %v1086_v34 = vld [vmem:[%s1505_s1 + $0x80] ss:$8 sps:$4 sm:$0xff]  }
   0xc   :  { %671 = vmatpush1.bf16.msra.mxu0 %v1051_v11  ;;  %609 = vmatprep.subr.bf16.mxu1 %v1052_v12  ;;  %v1081_v31 = vld [vmem:[%s1505_s1 + $0x170] ss:$8 sps:$4 sm:$0xff]   ;;  %v1084_v33 = vld [vmem:[%s1505_s1 + $0x184] ss:$8 sps:$4 sm:$0xff]   ;;  %v1087_v35 = vld [vmem:[%s1505_s1 + $0x180] ss:$8 sps:$4 sm:$0xff]  }
   0xd   :  { %672 = vmatprep.subr.bf16.mxu0 %v1054_v13  ;;  %v1088_v36 = vld [vmem:[%s1505_s1 + $0x94] ss:$8 sps:$4 sm:$0xff]   ;;  %v1092_v38 = vld [vmem:[%s1505_s1 + $0x90] ss:$8 sps:$4 sm:$0xff]   ;;  %v1094_v40 = vld [vmem:[%s1505_s1 + $0xa4] ss:$8 sps:$4 sm:$0xff]  }
   0xe   :  { %v1090_v37 = vld [vmem:[%s1505_s1 + $0x194] ss:$8 sps:$4 sm:$0xff]   ;;  %v1093_v39 = vld [vmem:[%s1505_s1 + $0x190] ss:$8 sps:$4 sm:$0xff]   ;;  %v1096_v41 = vld [vmem:[%s1505_s1 + $0x1a4] ss:$8 sps:$4 sm:$0xff]  }
   0xf   :  { %610 = vmatpush1.bf16.msra.mxu1 %v1056_v14  ;;  %v1098_v42 = vld [vmem:[%s1505_s1 + $0xa0] ss:$8 sps:$4 sm:$0xff]   ;;  %v1100_v44 = vld [vmem:[%s1505_s1 + $0xb4] ss:$8 sps:$4 sm:$0xff]   ;;  %v1104_v46 = vld [vmem:[%s1505_s1 + $0xb0] ss:$8 sps:$4 sm:$0xff]  }
  0x10   :  { %673 = vmatpush1.bf16.msra.mxu0 %v1057_v15  ;;  %611 = vmatprep.subr.bf16.mxu1 %v1058_v16  ;;  %v1099_v43 = vld [vmem:[%s1505_s1 + $0x1a0] ss:$8 sps:$4 sm:$0xff]   ;;  %v1102_v45 = vld [vmem:[%s1505_s1 + $0x1b4] ss:$8 sps:$4 sm:$0xff]   ;;  %v1105_v47 = vld [vmem:[%s1505_s1 + $0x1b0] ss:$8 sps:$4 sm:$0xff]  }
  0x11   :  { %674 = vmatprep.subr.bf16.mxu0 %v1060_v17  ;;  %v1106_v48 = vld [vmem:[%s1505_s1 + $0xc4] ss:$8 sps:$4 sm:$0xff]   ;;  %v1110_v52 = vld [vmem:[%s1505_s1 + $0xc0] ss:$8 sps:$4 sm:$0xff]   ;;  %v1112_v54 = vld [vmem:[%s1505_s1 + $0xd4] ss:$8 sps:$4 sm:$0xff]  }
  0x12   :  { %v1132_v49 = vld [vmem:[%s1506_s0 + $0x4] ss:$20 sps:$4 sm:$0xff]   ;;  %v1135_v51 = vld [vmem:[%s1506_s0 + $0xc] ss:$20 sps:$4 sm:$0xff]   ;;  %v1114_v55 = vld [vmem:[%s1505_s1 + $0x1d4] ss:$8 sps:$4 sm:$0xff]  }
  0x13   :  { %612 = vmatpush1.bf16.msra.mxu1 %v1062_v18  ;;  %v1108_v50 = vld [vmem:[%s1505_s1 + $0x1c4] ss:$8 sps:$4 sm:$0xff]   ;;  %635 = vmatprep.mubr.bf16.mxu1 %v1132_v49  ;;  %v1111_v53 = vld [vmem:[%s1505_s1 + $0x1c0] ss:$8 sps:$4 sm:$0xff]   ;;  %v1116_v56 = vld [vmem:[%s1505_s1 + $0xd0] ss:$8 sps:$4 sm:$0xff]  }
  0x14   :  { %675 = vmatpush1.bf16.msra.mxu0 %v1063_v19  ;;  %613 = vmatprep.subr.bf16.mxu1 %v1064_v20  ;;  %v1117_v57 = vld [vmem:[%s1505_s1 + $0x1d0] ss:$8 sps:$4 sm:$0xff]   ;;  %v1118_v58 = vld [vmem:[%s1505_s1 + $0xe4] ss:$8 sps:$4 sm:$0xff]   ;;  %v1122_v60 = vld [vmem:[%s1505_s1 + $0xe0] ss:$8 sps:$4 sm:$0xff]  }
  0x15   :  { %676 = vmatprep.subr.bf16.mxu0 %v1066_v21  ;;  %698 = vmatprep.mubr.bf16.mxu0 %v1135_v51  ;;  %v1120_v59 = vld [vmem:[%s1505_s1 + $0x1e4] ss:$8 sps:$4 sm:$0xff]   ;;  %v1123_v61 = vld [vmem:[%s1505_s1 + $0x1e0] ss:$8 sps:$4 sm:$0xff]   ;;  %v1124_v62 = vld [vmem:[%s1505_s1 + $0xf4] ss:$8 sps:$4 sm:$0xff]  }
  0x16   :  { %v1126_v63 = vld [vmem:[%s1505_s1 + $0x1f4] ss:$8 sps:$4 sm:$0xff]   ;;  %v1128_v0 = vld [vmem:[%s1505_s1 + $0xf0] ss:$8 sps:$4 sm:$0xff]   ;;  %v1138_v2 = vld [vmem:[%s1505_s1 + $0x204] ss:$8 sps:$4 sm:$0xff]  }
  0x17   :  { %614 = vmatpush1.bf16.msra.mxu1 %v1068_v22  ;;  %v1129_v1 = vld [vmem:[%s1505_s1 + $0x1f0] ss:$8 sps:$4 sm:$0xff]   ;;  %v1130_v3 = vld [vmem:[%s1506_s0] ss:$20 sps:$4 sm:$0xff]   ;;  %v1133_v4 = vld [vmem:[%s1506_s0 + $0x8] ss:$20 sps:$4 sm:$0xff]  }
  0x18   :  { %677 = vmatpush1.bf16.msra.mxu0 %v1069_v23  ;;  %615 = vmatprep.subr.bf16.mxu1 %v1070_v24  ;;  %v1136_v5 = vld [vmem:[%s1505_s1 + $0x200] ss:$8 sps:$4 sm:$0xff]   ;;  %v1141_v6 = vld [vmem:[%s1505_s1 + $0x214] ss:$8 sps:$4 sm:$0xff]   ;;  %v1139_v9 = vld [vmem:[%s1505_s1 + $0x210] ss:$8 sps:$4 sm:$0xff]  }
  0x19   :  { %678 = vmatprep.subr.bf16.mxu0 %v1072_v25  ;;  %v1145_v7 = vld [vmem:[%s1506_s0 + $0x2c] ss:$20 sps:$4 sm:$0xff]   ;;  %v1151_v8 = vld [vmem:[%s1506_s0 + $0x34] ss:$20 sps:$4 sm:$0xff]   ;;  %v1153_v12 = vld [vmem:[%s1506_s0 + $0x30] ss:$20 sps:$4 sm:$0xff]  }
  0x1a   :  { %v1144_v10 = vld [vmem:[%s1505_s1 + $0x224] ss:$8 sps:$4 sm:$0xff]   ;;  %v1150_v11 = vld [vmem:[%s1506_s0 + $0x28] ss:$20 sps:$4 sm:$0xff]   ;;  %v1147_v17 = vld [vmem:[%s1505_s1 + $0x230] ss:$8 sps:$4 sm:$0xff]  }
  0x1b   :  { %616 = vmatpush1.bf16.msra.mxu1 %v1074_v26  ;;  %v1142_v13 = vld [vmem:[%s1505_s1 + $0x220] ss:$8 sps:$4 sm:$0xff]   ;;  %v1149_v14 = vld [vmem:[%s1505_s1 + $0x234] ss:$8 sps:$4 sm:$0xff]   ;;  %v1156_v18 = vld [vmem:[%s1505_s1 + $0x244] ss:$8 sps:$4 sm:$0xff]  }
  0x1c   :  { %679 = vmatpush1.bf16.msra.mxu0 %v1075_v27  ;;  %617 = vmatprep.subr.bf16.mxu1 %v1076_v28  ;;  %v1157_v15 = vld [vmem:[%s1506_s0 + $0x54] ss:$20 sps:$4 sm:$0xff]   ;;  %v1163_v16 = vld [vmem:[%s1506_s0 + $0x5c] ss:$20 sps:$4 sm:$0xff]   ;;  %v1165_v20 = vld [vmem:[%s1506_s0 + $0x58] ss:$20 sps:$4 sm:$0xff]  }
  0x1d   :  { %680 = vmatprep.subr.bf16.mxu0 %v1078_v29  ;;  %v1162_v19 = vld [vmem:[%s1506_s0 + $0x50] ss:$20 sps:$4 sm:$0xff]   ;;  %v1154_v21 = vld [vmem:[%s1505_s1 + $0x240] ss:$8 sps:$4 sm:$0xff]   ;;  %v1161_v22 = vld [vmem:[%s1505_s1 + $0x254] ss:$8 sps:$4 sm:$0xff]  }
  0x1e   :  { %v1159_v23 = vld [vmem:[%s1505_s1 + $0x250] ss:$8 sps:$4 sm:$0xff]   ;;  %v1168_v24 = vld [vmem:[%s1505_s1 + $0x264] ss:$8 sps:$4 sm:$0xff]   ;;  %v1175_v25 = vmov 0  }
  0x1f   :  { %618 = vmatpush1.bf16.msra.mxu1 %v1080_v30  ;;  %v1166_v26 = vld [vmem:[%s1505_s1 + $0x260] ss:$8 sps:$4 sm:$0xff]   ;;  %v1171_v27 = vld [vmem:[%s1505_s1 + $0x274] ss:$8 sps:$4 sm:$0xff]   ;;  %v1169_v28 = vld [vmem:[%s1505_s1 + $0x270] ss:$8 sps:$4 sm:$0xff]  }
  0x20   :  { %681 = vmatpush1.bf16.msra.mxu0 %v1081_v31  ;;  %619 = vmatprep.subr.bf16.mxu1 %v1082_v32  ;;  %v1172_v29 = vld [vmem:[%s1506_s0 + $0x10] ss:$20 sps:$4 sm:$0xff]   ;;  %v1173_v30 = vld [vmem:[%s1506_s0 + $0x38] ss:$20 sps:$4 sm:$0xff]   ;;  %v1174_v31 = vld [vmem:[%s1506_s0 + $0x60] ss:$20 sps:$4 sm:$0xff]   ;;  %v115_v32 = vlaneseq }
  0x21   :  { %682 = vmatprep.subr.bf16.mxu0 %v1084_v33 }
  0x22   :  { %v116_v33 = vshrl.u32 %v115_v32, 7 }
  0x23   :  { %620 = vmatpush1.bf16.msra.mxu1 %v1086_v34 }
  0x24   :  { %683 = vmatpush1.bf16.msra.mxu0 %v1087_v35  ;;  %621 = vmatprep.subr.bf16.mxu1 %v1088_v36 }
  0x25   :  { %684 = vmatprep.subr.bf16.mxu0 %v1090_v37  ;;  %v117_v37 = vsub.s32 0, %v116_v33 }
  0x27   :  { %622 = vmatpush1.bf16.msra.mxu1 %v1092_v38 }
  0x28   :  { %685 = vmatpush1.bf16.msra.mxu0 %v1093_v39  ;;  %623 = vmatprep.subr.bf16.mxu1 %v1094_v40  ;;  %v113_v39 = vld [vmem:[%s1507_s2] sm:$0x3]  ;;  %v121_v40 = vsub.s32 1, %v116_v33 }
  0x29   :  { %686 = vmatprep.subr.bf16.mxu0 %v1096_v41  ;;  %v118_v41 = vrot.slane %v113_v39, %v117_v37 }
  0x2b   :  { %624 = vmatpush1.bf16.msra.mxu1 %v1098_v42  ;;  %v122_v42 = vrot.slane %v113_v39, %v121_v40 }
  0x2c   :  { %687 = vmatpush1.bf16.msra.mxu0 %v1099_v43  ;;  %625 = vmatprep.subr.bf16.mxu1 %v1100_v44 }
  0x2d   :  { %688 = vmatprep.subr.bf16.mxu0 %v1102_v45 }
  0x2f   :  { %626 = vmatpush1.bf16.msra.mxu1 %v1104_v46 }
  0x30   :  { %689 = vmatpush1.bf16.msra.mxu0 %v1105_v47  ;;  %627 = vmatprep.subr.bf16.mxu1 %v1106_v48 }
  0x31   :  { %690 = vmatprep.subr.bf16.mxu0 %v1108_v50 }
  0x33   :  { %628 = vmatpush1.bf16.msra.mxu1 %v1110_v52 }
  0x34   :  { %691 = vmatpush1.bf16.msra.mxu0 %v1111_v53  ;;  %629 = vmatprep.subr.bf16.mxu1 %v1112_v54 }
  0x35   :  { %692 = vmatprep.subr.bf16.mxu0 %v1114_v55 }
  0x37   :  { %630 = vmatpush1.bf16.msra.mxu1 %v1116_v56 }
  0x38   :  { %693 = vmatpush1.bf16.msra.mxu0 %v1117_v57  ;;  %631 = vmatprep.subr.bf16.mxu1 %v1118_v58 }
  0x39   :  { %694 = vmatprep.subr.bf16.mxu0 %v1120_v59 }
  0x3b   :  { %632 = vmatpush1.bf16.msra.mxu1 %v1122_v60 }
  0x3c   :  { %695 = vmatpush1.bf16.msra.mxu0 %v1123_v61  ;;  %633 = vmatprep.subr.bf16.mxu1 %v1124_v62 }
  0x3d   :  { %696 = vmatprep.subr.bf16.mxu0 %v1126_v63 }
  0x3f   :  { %634 = vmatpush1.bf16.msra.mxu1 %v1128_v0 }
  0x40   :  { %697 = vmatpush1.bf16.msra.mxu0 %v1129_v1  ;;  %981 = vmatprep.subr.bf16.mxu1 %v1138_v2 }
  0x41   :  { %729 = vmatprep.subr.bf16.mxu0 %v1138_v2 }
  0x42   :  { %636 = vmatmul.mubr.bf16.vlgmr.msra.gmra.mrb[0].mxu1 %v1130_v3 }
  0x43   :  { %699 = vmatmul.mubr.bf16.vlgmr.msra.gmra.mrb[0].mxu0 %v1133_v4  ;;  %989 = vmatpush1.bf16.msra.mxu1 %v1136_v5 }
  0x44   :  { %730 = vmatpush1.bf16.msra.mxu0 %v1136_v5  ;;  %982 = vmatprep.subr.bf16.mxu1 %v1141_v6 }
  0x45   :  { %731 = vmatprep.subr.bf16.mxu0 %v1141_v6  ;;  %645 = vmatprep.mubr.bf16.mxu1 %v1145_v7 }
  0x46   :  { %708 = vmatprep.mubr.bf16.mxu0 %v1151_v8 }
  0x47   :  { %990 = vmatpush1.bf16.msra.mxu1 %v1139_v9 }
  0x48   :  { %732 = vmatpush1.bf16.msra.mxu0 %v1139_v9  ;;  %983 = vmatprep.subr.bf16.mxu1 %v1144_v10 }
  0x49   :  { %733 = vmatprep.subr.bf16.mxu0 %v1144_v10 }
  0x4a   :  { %646 = vmatmul.mubr.bf16.gmra.mrb[4].mxu1 %v1150_v11 }
  0x4b   :  { %709 = vmatmul.mubr.bf16.gmra.mrb[4].mxu0 %v1153_v12  ;;  %991 = vmatpush1.bf16.msra.mxu1 %v1142_v13 }
  0x4c   :  { %734 = vmatpush1.bf16.msra.mxu0 %v1142_v13  ;;  %984 = vmatprep.subr.bf16.mxu1 %v1149_v14 }
  0x4d   :  { %735 = vmatprep.subr.bf16.mxu0 %v1149_v14  ;;  %655 = vmatprep.mubr.bf16.mxu1 %v1157_v15 }
  0x4e   :  { %718 = vmatprep.mubr.bf16.mxu0 %v1163_v16 }
  0x4f   :  { %992 = vmatpush1.bf16.msra.mxu1 %v1147_v17 }
  0x50   :  { %736 = vmatpush1.bf16.msra.mxu0 %v1147_v17  ;;  %985 = vmatprep.subr.bf16.mxu1 %v1156_v18 }
  0x51   :  { %737 = vmatprep.subr.bf16.mxu0 %v1156_v18 }
  0x52   :  { %656 = vmatmul.mubr.bf16.gmra.mrb[8].mxu1 %v1162_v19 }
  0x53   :  { %719 = vmatmul.mubr.bf16.gmra.mrb[8].mxu0 %v1165_v20  ;;  %993 = vmatpush1.bf16.msra.mxu1 %v1154_v21 }
  0x54   :  { %738 = vmatpush1.bf16.msra.mxu0 %v1154_v21  ;;  %986 = vmatprep.subr.bf16.mxu1 %v1161_v22 }
  0x55   :  { %739 = vmatprep.subr.bf16.mxu0 %v1161_v22  ;;  %761 = vmatprep.mubr.bf16.mxu0 %v1175_v25 }
  0x56   :  { %771 = vmatprep.mubr.bf16.mxu1 %v1175_v25 }
  0x57   :  { %994 = vmatpush1.bf16.msra.mxu1 %v1159_v23 }
  0x58   :  { %740 = vmatpush1.bf16.msra.mxu0 %v1159_v23  ;;  %987 = vmatprep.subr.bf16.mxu1 %v1168_v24 }
  0x59   :  { %741 = vmatprep.subr.bf16.mxu0 %v1168_v24 }
  0x5b   :  { %995 = vmatpush1.bf16.msra.mxu1 %v1166_v26 }
  0x5c   :  { %742 = vmatpush1.bf16.msra.mxu0 %v1166_v26  ;;  %988 = vmatprep.subr.bf16.mxu1 %v1171_v27 }
  0x5d   :  { %743 = vmatprep.subr.bf16.mxu0 %v1171_v27 }
  0x5f   :  { %996 = vmatpush1.bf16.msra.mxu1 %v1169_v28 }
  0x60   :  { %744 = vmatpush1.bf16.msra.mxu0 %v1169_v28 }
  0x62   :  { %772 = vmatmul.mubr.bf16.vlgmr.msra.gmra.mrb[12].mxu1 %v1173_v30 }
  0x63   :  { %762 = vmatmul.mubr.bf16.vlgmr.msra.gmra.mrb[0].mxu0 %v1172_v29  ;;  %781 = vmatprep.mubr.bf16.mxu1 %v1175_v25 }
  0x6a   :  { %782 = vmatmul.mubr.bf16.gmra.mrb[16].mxu1 %v1174_v31 }
 0x115   :  { %v637_v34 = vpop.f32.mrb[0].mxu1 }
 0x116   :  { %v639_v35 = vpop.f32.mrb[1].mxu1  ;;  %v638_v11 = vadd.f32 %v637_v34, %v118_v41 }
 0x117   :  { %v641_v36 = vpop.f32.mrb[2].mxu1  ;;  %v640_v12 = vadd.f32 %v639_v35, %v122_v42 }
 0x118   :  { %v643_v38 = vpop.f32.mrb[3].mxu1  ;;  %v642_v19 = vadd.f32 %v641_v36, %v118_v41 }
 0x119   :  { %v644_v20 = vadd.f32 %v643_v38, %v122_v42 }
 0x11d   :  { %v647_v43 = vpop.f32.mrb[4].mxu1 }
 0x11e   :  { %v710_v44 = vpop.f32.mrb[4].mxu0  ;;  %v648_v45 = vadd.f32 %v647_v43, %v118_v41  ;;  %v649_v46 = vpop.f32.mrb[5].mxu1 }
 0x11f   :  { %v712_v47 = vpop.f32.mrb[5].mxu0  ;;  %v650_v48 = vadd.f32 %v649_v46, %v122_v42  ;;  %v651_v49 = vpop.f32.mrb[6].mxu1 }
 0x120   :  { %v714_v50 = vpop.f32.mrb[6].mxu0  ;;  %v652_v51 = vadd.f32 %v651_v49, %v118_v41  ;;  %v711_v52 = vadd.f32 %v710_v44, %v648_v45  ;;  %v653_v53 = vpop.f32.mrb[7].mxu1 }
 0x121   :  { %v716_v54 = vpop.f32.mrb[7].mxu0  ;;  %v654_v55 = vadd.f32 %v653_v53, %v122_v42  ;;  %v713_v56 = vadd.f32 %v712_v47, %v650_v48 }
 0x122   :  { %v715_v57 = vadd.f32 %v714_v50, %v652_v51 }
 0x123   :  { %v717_v58 = vadd.f32 %v716_v54, %v654_v55 }
 0x125   :  { %v657_v59 = vpop.f32.mrb[8].mxu1 }
 0x126   :  { %v720_v60 = vpop.f32.mrb[8].mxu0  ;;  %v658_v61 = vadd.f32 %v657_v59, %v118_v41  ;;  %v659_v62 = vpop.f32.mrb[9].mxu1 }
 0x127   :  { %v722_v63 = vpop.f32.mrb[9].mxu0  ;;  %v660_v0 = vadd.f32 %v659_v62, %v122_v42  ;;  %v661_v1 = vpop.f32.mrb[10].mxu1 }
 0x128   :  { %v724_v2 = vpop.f32.mrb[10].mxu0  ;;  %v662_v3 = vadd.f32 %v661_v1, %v118_v41  ;;  %v721_v4 = vadd.f32 %v720_v60, %v658_v61  ;;  %v663_v5 = vpop.f32.mrb[11].mxu1 }
 0x129   :  { %v726_v6 = vpop.f32.mrb[11].mxu0  ;;  %v664_v7 = vadd.f32 %v663_v5, %v122_v42  ;;  %v723_v8 = vadd.f32 %v722_v63, %v660_v0 }
 0x12a   :  { %v725_v9 = vadd.f32 %v724_v2, %v662_v3 }
 0x12b   :  { %v1484_v10 = vadd.f32 %v726_v6, %v664_v7 }
 0x135   :  { %v773_v14 = vpop.f32.mrb[12].mxu1 }
 0x136   :  { %v763_v13 = vpop.f32.mrb[0].mxu0  ;;  %v774_v16 = vadd.f32 %v773_v14, %v711_v52  ;;  %v775_v18 = vpop.f32.mrb[13].mxu1 }
 0x137   :  { %v998_v15 = vadd.f32 %v763_v13, %v638_v11  ;;  %v765_v17 = vpop.f32.mrb[1].mxu0  ;;  %v776_v22 = vadd.f32 %v775_v18, %v713_v56  ;;  %v777_v24 = vpop.f32.mrb[14].mxu1 }
 0x138   :  { %v1000_v21 = vadd.f32 %v765_v17, %v640_v12  ;;  %v767_v23 = vpop.f32.mrb[2].mxu0  ;;  %vm796_vm1 = vcmp.ge.f32.partialorder %v774_v16, 0.0  ;;  %v808_v26 = vmul.f32 0.01, %v774_v16  ;;  %v778_v32 = vadd.f32 %v777_v24, %v715_v57  ;;  %v779_v34 = vpop.f32.mrb[15].mxu1 }
 0x139   :  { %vm792_vm0 = vcmp.ge.f32.partialorder %v998_v15, 0.0  ;;  %v804_v25 = vmul.f32 0.01, %v998_v15  ;;  %vm797_vm3 = vcmp.ge.f32.partialorder %v776_v22, 0.0  ;;  %v809_v28 = vmul.f32 0.01, %v776_v22 }
 0x13a   :  { %vm793_vm2 = vcmp.ge.f32.partialorder %v1000_v21, 0.0  ;;  %v805_v27 = vmul.f32 0.01, %v1000_v21  ;;  %v820_v30 = vsel %vm796_vm1, %v774_v16, %v808_v26  ;;  %v1002_v31 = vadd.f32 %v767_v23, %v642_v19  ;;  %v769_v33 = vpop.f32.mrb[3].mxu0 }
 0x13b   :  { %v816_v29 = vsel %vm792_vm0, %v998_v15, %v804_v25  ;;  %v821_v36 = vsel %vm797_vm3, %v776_v22, %v809_v28  ;;  %v1004_v37 = vadd.f32 %v769_v33, %v644_v20  ;;  %v780_v38 = vadd.f32 %v779_v34, %v717_v58 }
 0x13c   :  { %v817_v35 = vsel %vm793_vm2, %v1000_v21, %v805_v27  ;;  %v977_v40 = vpack.c.bf16 %v821_v36, %v820_v30  ;;  %vm794_vm4 = vcmp.ge.f32.partialorder %v1002_v31, 0.0  ;;  %v806_v41 = vmul.f32 0.01, %v1002_v31 }
 0x13d   :  { %v975_v39 = vpack.c.bf16 %v817_v35, %v816_v29  ;;  %vm798_vm5 = vcmp.ge.f32.partialorder %v778_v32, 0.0  ;;  %v810_v42 = vmul.f32 0.01, %v778_v32  ;;  %vm795_vm6 = vcmp.ge.f32.partialorder %v1004_v37, 0.0  ;;  %v783_v46 = vpop.f32.mrb[16].mxu1 }
 0x13e   :  { %v807_v43 = vmul.f32 0.01, %v1004_v37  ;;  %866 = vst [vmem:[%s1508_s3 + $0x10] sm:$0xff] %v977_v40  ;;  %v818_v44 = vsel %vm794_vm4, %v1002_v31, %v806_v41  ;;  %vm799_vm7 = vcmp.ge.f32.partialorder %v780_v38, 0.0  ;;  %v811_v45 = vmul.f32 0.01, %v780_v38 }
 0x13f   :  { %864 = vst [vmem:[%s1508_s3] sm:$0xff] %v975_v39  ;;  %v822_v47 = vsel %vm798_vm5, %v778_v32, %v810_v42  ;;  %v784_v49 = vadd.f32 %v783_v46, %v721_v4  ;;  %v785_v50 = vpop.f32.mrb[17].mxu1 }
 0x140   :  { %v819_v48 = vsel %vm795_vm6, %v1004_v37, %v807_v43  ;;  %v823_v52 = vsel %vm799_vm7, %v780_v38, %v811_v45  ;;  %v786_v53 = vadd.f32 %v785_v50, %v723_v8  ;;  %v787_v54 = vpop.f32.mrb[18].mxu1 }
 0x141   :  { %v976_v51 = vpack.c.bf16 %v819_v48, %v818_v44  ;;  %v978_v55 = vpack.c.bf16 %v823_v52, %v822_v47  ;;  %vm800_vm8 = vcmp.ge.f32.partialorder %v784_v49, 0.0  ;;  %v812_v56 = vmul.f32 0.01, %v784_v49  ;;  %v789_v58 = vpop.f32.mrb[19].mxu1 }
 0x142   :  { %v788_v57 = vadd.f32 %v787_v54, %v725_v9  ;;  %vm801_vm9 = vcmp.ge.f32.partialorder %v786_v53, 0.0  ;;  %v813_v59 = vmul.f32 0.01, %v786_v53  ;;  %v790_v60 = vadd.f32 %v789_v58, %v1484_v10 }
 0x143   :  { %865 = vst [vmem:[%s1508_s3 + $0x8] sm:$0xff] %v976_v51  ;;  %867 = vst [vmem:[%s1508_s3 + $0x18] sm:$0xff] %v978_v55  ;;  %v824_v61 = vsel %vm800_vm8, %v784_v49, %v812_v56 }
 0x144   :  { %vm802_vm10 = vcmp.ge.f32.partialorder %v788_v57, 0.0  ;;  %v814_v62 = vmul.f32 0.01, %v788_v57  ;;  %v825_v63 = vsel %vm801_vm9, %v786_v53, %v813_v59  ;;  %vm803_vm11 = vcmp.ge.f32.partialorder %v790_v60, 0.0 }
 0x145   :  { %v815_v0 = vmul.f32 0.01, %v790_v60  ;;  %v979_v1 = vpack.c.bf16 %v825_v63, %v824_v61 }
 0x146   :  { %v826_v2 = vsel %vm802_vm10, %v788_v57, %v814_v62 }
 0x147   :  { %v827_v3 = vsel %vm803_vm11, %v790_v60, %v815_v0  ;;  %868 = vst [vmem:[%s1508_s3 + $0x20] sm:$0xff] %v979_v1 }
 0x148   :  { %v980_v4 = vpack.c.bf16 %v827_v3, %v826_v2 }
 0x14a   :  { %869 = vst [vmem:[%s1508_s3 + $0x28] sm:$0xff] %v980_v4 }

// kernel: submpd_forward.8
= control target key start
LH: loop header
LB: loop body
LE: loop exit
PB: predicated region body
PF: predicated region fallthrough
CT: control target
= control target key end

     0   :  { %s2279_s1 = inlined_call_operand.vmem [shape: bf16[1280,256], index: 1, kind: input, shape index: {}]   ;;  %s2280_s0 = inlined_call_operand.vmem [shape: bf16[16,1280], index: 0, kind: input, shape index: {}]   ;;  %s2281_s2 = inlined_call_operand.vmem [shape: f32[1,256], index: 2, kind: input, shape index: {}]   ;;  %s2282_s3 = inlined_call_operand.vmem [shape: bf16[16,256], index: 3, kind: output, shape index: {}]  }
   0x1   :  { %v1485_v0 = vld [vmem:[%s2279_s1 + $0x4] ss:$8 sps:$4 sm:$0xff]   ;;  %v1489_v2 = vld [vmem:[%s2279_s1] ss:$8 sps:$4 sm:$0xff]   ;;  %v1491_v4 = vld [vmem:[%s2279_s1 + $0x14] ss:$8 sps:$4 sm:$0xff]  }
   0x2   :  { %v1487_v1 = vld [vmem:[%s2279_s1 + $0x204] ss:$8 sps:$4 sm:$0xff]   ;;  %1046 = vmatprep.subr.bf16.mxu1 %v1485_v0  ;;  %v1490_v3 = vld [vmem:[%s2279_s1 + $0x200] ss:$8 sps:$4 sm:$0xff]   ;;  %v1493_v5 = vld [vmem:[%s2279_s1 + $0x214] ss:$8 sps:$4 sm:$0xff]  }
   0x3   :  { %1132 = vmatprep.subr.bf16.mxu0 %v1487_v1  ;;  %1047 = vmatpush1.bf16.msra.mxu1 %v1489_v2  ;;  %v1495_v6 = vld [vmem:[%s2279_s1 + $0x10] ss:$8 sps:$4 sm:$0xff]   ;;  %v1497_v8 = vld [vmem:[%s2279_s1 + $0x24] ss:$8 sps:$4 sm:$0xff]   ;;  %v1501_v10 = vld [vmem:[%s2279_s1 + $0x20] ss:$8 sps:$4 sm:$0xff]  }
   0x4   :  { %1133 = vmatpush1.bf16.msra.mxu0 %v1490_v3  ;;  %1048 = vmatprep.subr.bf16.mxu1 %v1491_v4  ;;  %v1496_v7 = vld [vmem:[%s2279_s1 + $0x210] ss:$8 sps:$4 sm:$0xff]   ;;  %v1499_v9 = vld [vmem:[%s2279_s1 + $0x224] ss:$8 sps:$4 sm:$0xff]   ;;  %v1502_v11 = vld [vmem:[%s2279_s1 + $0x220] ss:$8 sps:$4 sm:$0xff]  }
   0x5   :  { %1134 = vmatprep.subr.bf16.mxu0 %v1493_v5  ;;  %v1503_v12 = vld [vmem:[%s2279_s1 + $0x34] ss:$8 sps:$4 sm:$0xff]   ;;  %v1507_v14 = vld [vmem:[%s2279_s1 + $0x30] ss:$8 sps:$4 sm:$0xff]   ;;  %v1509_v16 = vld [vmem:[%s2279_s1 + $0x44] ss:$8 sps:$4 sm:$0xff]  }
   0x6   :  { %v1505_v13 = vld [vmem:[%s2279_s1 + $0x234] ss:$8 sps:$4 sm:$0xff]   ;;  %v1508_v15 = vld [vmem:[%s2279_s1 + $0x230] ss:$8 sps:$4 sm:$0xff]   ;;  %v1511_v17 = vld [vmem:[%s2279_s1 + $0x244] ss:$8 sps:$4 sm:$0xff]  }
   0x7   :  { %1049 = vmatpush1.bf16.msra.mxu1 %v1495_v6  ;;  %v1513_v18 = vld [vmem:[%s2279_s1 + $0x40] ss:$8 sps:$4 sm:$0xff]   ;;  %v1515_v20 = vld [vmem:[%s2279_s1 + $0x54] ss:$8 sps:$4 sm:$0xff]   ;;  %v1519_v22 = vld [vmem:[%s2279_s1 + $0x50] ss:$8 sps:$4 sm:$0xff]  }
   0x8   :  { %1135 = vmatpush1.bf16.msra.mxu0 %v1496_v7  ;;  %1050 = vmatprep.subr.bf16.mxu1 %v1497_v8  ;;  %v1514_v19 = vld [vmem:[%s2279_s1 + $0x240] ss:$8 sps:$4 sm:$0xff]   ;;  %v1517_v21 = vld [vmem:[%s2279_s1 + $0x254] ss:$8 sps:$4 sm:$0xff]   ;;  %v1520_v23 = vld [vmem:[%s2279_s1 + $0x250] ss:$8 sps:$4 sm:$0xff]  }
   0x9   :  { %1136 = vmatprep.subr.bf16.mxu0 %v1499_v9  ;;  %v1521_v24 = vld [vmem:[%s2279_s1 + $0x64] ss:$8 sps:$4 sm:$0xff]   ;;  %v1525_v26 = vld [vmem:[%s2279_s1 + $0x60] ss:$8 sps:$4 sm:$0xff]   ;;  %v1527_v28 = vld [vmem:[%s2279_s1 + $0x74] ss:$8 sps:$4 sm:$0xff]  }
   0xa   :  { %v1523_v25 = vld [vmem:[%s2279_s1 + $0x264] ss:$8 sps:$4 sm:$0xff]   ;;  %v1526_v27 = vld [vmem:[%s2279_s1 + $0x260] ss:$8 sps:$4 sm:$0xff]   ;;  %v1529_v29 = vld [vmem:[%s2279_s1 + $0x274] ss:$8 sps:$4 sm:$0xff]  }
   0xb   :  { %1051 = vmatpush1.bf16.msra.mxu1 %v1501_v10  ;;  %v1531_v30 = vld [vmem:[%s2279_s1 + $0x70] ss:$8 sps:$4 sm:$0xff]   ;;  %v1533_v32 = vld [vmem:[%s2279_s1 + $0x84] ss:$8 sps:$4 sm:$0xff]   ;;  %v1537_v34 = vld [vmem:[%s2279_s1 + $0x80] ss:$8 sps:$4 sm:$0xff]  }
   0xc   :  { %1137 = vmatpush1.bf16.msra.mxu0 %v1502_v11  ;;  %1052 = vmatprep.subr.bf16.mxu1 %v1503_v12  ;;  %v1532_v31 = vld [vmem:[%s2279_s1 + $0x270] ss:$8 sps:$4 sm:$0xff]   ;;  %v1535_v33 = vld [vmem:[%s2279_s1 + $0x284] ss:$8 sps:$4 sm:$0xff]   ;;  %v1538_v35 = vld [vmem:[%s2279_s1 + $0x280] ss:$8 sps:$4 sm:$0xff]  }
   0xd   :  { %1138 = vmatprep.subr.bf16.mxu0 %v1505_v13  ;;  %v1539_v36 = vld [vmem:[%s2279_s1 + $0x94] ss:$8 sps:$4 sm:$0xff]   ;;  %v1543_v38 = vld [vmem:[%s2279_s1 + $0x90] ss:$8 sps:$4 sm:$0xff]   ;;  %v1545_v40 = vld [vmem:[%s2279_s1 + $0xa4] ss:$8 sps:$4 sm:$0xff]  }
   0xe   :  { %v1541_v37 = vld [vmem:[%s2279_s1 + $0x294] ss:$8 sps:$4 sm:$0xff]   ;;  %v1544_v39 = vld [vmem:[%s2279_s1 + $0x290] ss:$8 sps:$4 sm:$0xff]   ;;  %v1547_v41 = vld [vmem:[%s2279_s1 + $0x2a4] ss:$8 sps:$4 sm:$0xff]  }
   0xf   :  { %1053 = vmatpush1.bf16.msra.mxu1 %v1507_v14  ;;  %v1549_v42 = vld [vmem:[%s2279_s1 + $0xa0] ss:$8 sps:$4 sm:$0xff]   ;;  %v1551_v44 = vld [vmem:[%s2279_s1 + $0xb4] ss:$8 sps:$4 sm:$0xff]   ;;  %v1555_v46 = vld [vmem:[%s2279_s1 + $0xb0] ss:$8 sps:$4 sm:$0xff]  }
  0x10   :  { %1139 = vmatpush1.bf16.msra.mxu0 %v1508_v15  ;;  %1054 = vmatprep.subr.bf16.mxu1 %v1509_v16  ;;  %v1550_v43 = vld [vmem:[%s2279_s1 + $0x2a0] ss:$8 sps:$4 sm:$0xff]   ;;  %v1553_v45 = vld [vmem:[%s2279_s1 + $0x2b4] ss:$8 sps:$4 sm:$0xff]   ;;  %v1556_v47 = vld [vmem:[%s2279_s1 + $0x2b0] ss:$8 sps:$4 sm:$0xff]  }
  0x11   :  { %1140 = vmatprep.subr.bf16.mxu0 %v1511_v17  ;;  %v1583_v48 = vld [vmem:[%s2280_s0 + $0x4] ss:$40 sps:$4 sm:$0xff]   ;;  %v1589_v51 = vld [vmem:[%s2280_s0 + $0x14] ss:$40 sps:$4 sm:$0xff]   ;;  %v1561_v52 = vld [vmem:[%s2279_s1 + $0xc0] ss:$8 sps:$4 sm:$0xff]  }
  0x12   :  { %v1557_v49 = vld [vmem:[%s2279_s1 + $0xc4] ss:$8 sps:$4 sm:$0xff]   ;;  %1078 = vmatprep.mubr.bf16.mxu1 %v1583_v48  ;;  %v1562_v53 = vld [vmem:[%s2279_s1 + $0x2c0] ss:$8 sps:$4 sm:$0xff]   ;;  %v1563_v54 = vld [vmem:[%s2279_s1 + $0xd4] ss:$8 sps:$4 sm:$0xff]   ;;  %1164 = vmatprep.mubr.bf16.mxu0 %v1589_v51 }
  0x13   :  { %1055 = vmatpush1.bf16.msra.mxu1 %v1513_v18  ;;  %v1559_v50 = vld [vmem:[%s2279_s1 + $0x2c4] ss:$8 sps:$4 sm:$0xff]   ;;  %v1565_v55 = vld [vmem:[%s2279_s1 + $0x2d4] ss:$8 sps:$4 sm:$0xff]   ;;  %v1567_v56 = vld [vmem:[%s2279_s1 + $0xd0] ss:$8 sps:$4 sm:$0xff]  }
  0x14   :  { %1141 = vmatpush1.bf16.msra.mxu0 %v1514_v19  ;;  %1056 = vmatprep.subr.bf16.mxu1 %v1515_v20  ;;  %v1568_v57 = vld [vmem:[%s2279_s1 + $0x2d0] ss:$8 sps:$4 sm:$0xff]   ;;  %v1569_v58 = vld [vmem:[%s2279_s1 + $0xe4] ss:$8 sps:$4 sm:$0xff]   ;;  %v1573_v60 = vld [vmem:[%s2279_s1 + $0xe0] ss:$8 sps:$4 sm:$0xff]  }
  0x15   :  { %1142 = vmatprep.subr.bf16.mxu0 %v1517_v21  ;;  %v1571_v59 = vld [vmem:[%s2279_s1 + $0x2e4] ss:$8 sps:$4 sm:$0xff]   ;;  %v1574_v61 = vld [vmem:[%s2279_s1 + $0x2e0] ss:$8 sps:$4 sm:$0xff]   ;;  %v1575_v62 = vld [vmem:[%s2279_s1 + $0xf4] ss:$8 sps:$4 sm:$0xff]  }
  0x16   :  { %v1577_v63 = vld [vmem:[%s2279_s1 + $0x2f4] ss:$8 sps:$4 sm:$0xff]   ;;  %v1579_v0 = vld [vmem:[%s2279_s1 + $0xf0] ss:$8 sps:$4 sm:$0xff]   ;;  %v1586_v2 = vld [vmem:[%s2279_s1 + $0x104] ss:$8 sps:$4 sm:$0xff]  }
  0x17   :  { %1057 = vmatpush1.bf16.msra.mxu1 %v1519_v22  ;;  %v1580_v1 = vld [vmem:[%s2279_s1 + $0x2f0] ss:$8 sps:$4 sm:$0xff]   ;;  %v1592_v3 = vld [vmem:[%s2279_s1 + $0x304] ss:$8 sps:$4 sm:$0xff]   ;;  %v1581_v4 = vld [vmem:[%s2280_s0] ss:$40 sps:$4 sm:$0xff]  }
  0x18   :  { %1143 = vmatpush1.bf16.msra.mxu0 %v1520_v23  ;;  %1058 = vmatprep.subr.bf16.mxu1 %v1521_v24  ;;  %v1584_v5 = vld [vmem:[%s2279_s1 + $0x100] ss:$8 sps:$4 sm:$0xff]   ;;  %v1587_v6 = vld [vmem:[%s2280_s0 + $0x10] ss:$40 sps:$4 sm:$0xff]   ;;  %v1595_v8 = vld [vmem:[%s2279_s1 + $0x114] ss:$8 sps:$4 sm:$0xff]  }
  0x19   :  { %1144 = vmatprep.subr.bf16.mxu0 %v1523_v25  ;;  %v1590_v7 = vld [vmem:[%s2279_s1 + $0x300] ss:$8 sps:$4 sm:$0xff]   ;;  %v1598_v9 = vld [vmem:[%s2279_s1 + $0x314] ss:$8 sps:$4 sm:$0xff]   ;;  %v1593_v10 = vld [vmem:[%s2279_s1 + $0x110] ss:$8 sps:$4 sm:$0xff]  }
  0x1a   :  { %v1596_v11 = vld [vmem:[%s2279_s1 + $0x310] ss:$8 sps:$4 sm:$0xff]   ;;  %v1601_v12 = vld [vmem:[%s2279_s1 + $0x124] ss:$8 sps:$4 sm:$0xff]   ;;  %v1599_v14 = vld [vmem:[%s2279_s1 + $0x120] ss:$8 sps:$4 sm:$0xff]  }
  0x1b   :  { %1059 = vmatpush1.bf16.msra.mxu1 %v1525_v26  ;;  %v1604_v13 = vld [vmem:[%s2279_s1 + $0x324] ss:$8 sps:$4 sm:$0xff]   ;;  %v1602_v15 = vld [vmem:[%s2279_s1 + $0x320] ss:$8 sps:$4 sm:$0xff]   ;;  %v1607_v16 = vld [vmem:[%s2279_s1 + $0x134] ss:$8 sps:$4 sm:$0xff]  }
  0x1c   :  { %1145 = vmatpush1.bf16.msra.mxu0 %v1526_v27  ;;  %1060 = vmatprep.subr.bf16.mxu1 %v1527_v28  ;;  %v1610_v17 = vld [vmem:[%s2279_s1 + $0x334] ss:$8 sps:$4 sm:$0xff]   ;;  %v1605_v18 = vld [vmem:[%s2279_s1 + $0x130] ss:$8 sps:$4 sm:$0xff]   ;;  %v1613_v20 = vld [vmem:[%s2279_s1 + $0x144] ss:$8 sps:$4 sm:$0xff]  }
  0x1d   :  { %1146 = vmatprep.subr.bf16.mxu0 %v1529_v29  ;;  %v1608_v19 = vld [vmem:[%s2279_s1 + $0x330] ss:$8 sps:$4 sm:$0xff]   ;;  %v1616_v21 = vld [vmem:[%s2279_s1 + $0x344] ss:$8 sps:$4 sm:$0xff]   ;;  %v1611_v22 = vld [vmem:[%s2279_s1 + $0x140] ss:$8 sps:$4 sm:$0xff]  }
  0x1e   :  { %v1614_v23 = vld [vmem:[%s2279_s1 + $0x340] ss:$8 sps:$4 sm:$0xff]   ;;  %v1619_v24 = vld [vmem:[%s2279_s1 + $0x154] ss:$8 sps:$4 sm:$0xff]   ;;  %v1617_v26 = vld [vmem:[%s2279_s1 + $0x150] ss:$8 sps:$4 sm:$0xff]  }
  0x1f   :  { %1061 = vmatpush1.bf16.msra.mxu1 %v1531_v30  ;;  %v1622_v25 = vld [vmem:[%s2279_s1 + $0x354] ss:$8 sps:$4 sm:$0xff]   ;;  %v1620_v27 = vld [vmem:[%s2279_s1 + $0x350] ss:$8 sps:$4 sm:$0xff]   ;;  %v1625_v28 = vld [vmem:[%s2279_s1 + $0x164] ss:$8 sps:$4 sm:$0xff]  }
  0x20   :  { %1147 = vmatpush1.bf16.msra.mxu0 %v1532_v31  ;;  %1062 = vmatprep.subr.bf16.mxu1 %v1533_v32  ;;  %v1628_v29 = vld [vmem:[%s2279_s1 + $0x364] ss:$8 sps:$4 sm:$0xff]   ;;  %v1623_v30 = vld [vmem:[%s2279_s1 + $0x160] ss:$8 sps:$4 sm:$0xff]   ;;  %v1631_v32 = vld [vmem:[%s2279_s1 + $0x174] ss:$8 sps:$4 sm:$0xff]  }
  0x21   :  { %1148 = vmatprep.subr.bf16.mxu0 %v1535_v33  ;;  %v1626_v31 = vld [vmem:[%s2279_s1 + $0x360] ss:$8 sps:$4 sm:$0xff]   ;;  %v1634_v33 = vld [vmem:[%s2279_s1 + $0x374] ss:$8 sps:$4 sm:$0xff]  }
  0x22   :  { %v1647_v48 = vld [vmem:[%s2279_s1 + $0x1a0] ss:$8 sps:$4 sm:$0xff]   ;;  %v1658_v51 = vld [vmem:[%s2279_s1 + $0x3b4] ss:$8 sps:$4 sm:$0xff]  }
  0x23   :  { %1063 = vmatpush1.bf16.msra.mxu1 %v1537_v34  ;;  %v1685_v34 = vld [vmem:[%s2280_s0 + $0xc] ss:$40 sps:$4 sm:$0xff]  }
  0x24   :  { %1149 = vmatpush1.bf16.msra.mxu0 %v1538_v35  ;;  %1064 = vmatprep.subr.bf16.mxu1 %v1539_v36  ;;  %v1688_v35 = vld [vmem:[%s2280_s0 + $0x1c] ss:$40 sps:$4 sm:$0xff]   ;;  %v1629_v36 = vld [vmem:[%s2279_s1 + $0x170] ss:$8 sps:$4 sm:$0xff]  }
  0x25   :  { %1150 = vmatprep.subr.bf16.mxu0 %v1541_v37  ;;  %v1632_v37 = vld [vmem:[%s2279_s1 + $0x370] ss:$8 sps:$4 sm:$0xff]  }
  0x27   :  { %1065 = vmatpush1.bf16.msra.mxu1 %v1543_v38  ;;  %v1637_v38 = vld [vmem:[%s2279_s1 + $0x184] ss:$8 sps:$4 sm:$0xff]  }
  0x28   :  { %1151 = vmatpush1.bf16.msra.mxu0 %v1544_v39  ;;  %1066 = vmatprep.subr.bf16.mxu1 %v1545_v40  ;;  %v1640_v39 = vld [vmem:[%s2279_s1 + $0x384] ss:$8 sps:$4 sm:$0xff]   ;;  %v1635_v40 = vld [vmem:[%s2279_s1 + $0x180] ss:$8 sps:$4 sm:$0xff]  }
  0x29   :  { %1152 = vmatprep.subr.bf16.mxu0 %v1547_v41  ;;  %v1638_v41 = vld [vmem:[%s2279_s1 + $0x380] ss:$8 sps:$4 sm:$0xff]  }
  0x2b   :  { %1067 = vmatpush1.bf16.msra.mxu1 %v1549_v42  ;;  %v1643_v42 = vld [vmem:[%s2279_s1 + $0x194] ss:$8 sps:$4 sm:$0xff]  }
  0x2c   :  { %1153 = vmatpush1.bf16.msra.mxu0 %v1550_v43  ;;  %1068 = vmatprep.subr.bf16.mxu1 %v1551_v44  ;;  %v1646_v43 = vld [vmem:[%s2279_s1 + $0x394] ss:$8 sps:$4 sm:$0xff]   ;;  %v1641_v44 = vld [vmem:[%s2279_s1 + $0x190] ss:$8 sps:$4 sm:$0xff]  }
  0x2d   :  { %1154 = vmatprep.subr.bf16.mxu0 %v1553_v45  ;;  %v1644_v45 = vld [vmem:[%s2279_s1 + $0x390] ss:$8 sps:$4 sm:$0xff]  }
  0x2f   :  { %1069 = vmatpush1.bf16.msra.mxu1 %v1555_v46  ;;  %v1649_v46 = vld [vmem:[%s2279_s1 + $0x1a4] ss:$8 sps:$4 sm:$0xff]  }
  0x30   :  { %1155 = vmatpush1.bf16.msra.mxu0 %v1556_v47  ;;  %1070 = vmatprep.subr.bf16.mxu1 %v1557_v49  ;;  %v1652_v47 = vld [vmem:[%s2279_s1 + $0x3a4] ss:$8 sps:$4 sm:$0xff]   ;;  %v1650_v49 = vld [vmem:[%s2279_s1 + $0x3a0] ss:$8 sps:$4 sm:$0xff]  }
  0x31   :  { %1156 = vmatprep.subr.bf16.mxu0 %v1559_v50  ;;  %v1655_v50 = vld [vmem:[%s2279_s1 + $0x1b4] ss:$8 sps:$4 sm:$0xff]  }
  0x33   :  { %1071 = vmatpush1.bf16.msra.mxu1 %v1561_v52  ;;  %v1653_v52 = vld [vmem:[%s2279_s1 + $0x1b0] ss:$8 sps:$4 sm:$0xff]  }
  0x34   :  { %1157 = vmatpush1.bf16.msra.mxu0 %v1562_v53  ;;  %1072 = vmatprep.subr.bf16.mxu1 %v1563_v54  ;;  %v1656_v53 = vld [vmem:[%s2279_s1 + $0x3b0] ss:$8 sps:$4 sm:$0xff]   ;;  %v1661_v54 = vld [vmem:[%s2279_s1 + $0x1c4] ss:$8 sps:$4 sm:$0xff]  }
  0x35   :  { %1158 = vmatprep.subr.bf16.mxu0 %v1565_v55  ;;  %v1664_v55 = vld [vmem:[%s2279_s1 + $0x3c4] ss:$8 sps:$4 sm:$0xff]  }
  0x37   :  { %1073 = vmatpush1.bf16.msra.mxu1 %v1567_v56  ;;  %v1659_v56 = vld [vmem:[%s2279_s1 + $0x1c0] ss:$8 sps:$4 sm:$0xff]  }
  0x38   :  { %1159 = vmatpush1.bf16.msra.mxu0 %v1568_v57  ;;  %1074 = vmatprep.subr.bf16.mxu1 %v1569_v58  ;;  %v1662_v57 = vld [vmem:[%s2279_s1 + $0x3c0] ss:$8 sps:$4 sm:$0xff]   ;;  %v1667_v58 = vld [vmem:[%s2279_s1 + $0x1d4] ss:$8 sps:$4 sm:$0xff]  }
  0x39   :  { %1160 = vmatprep.subr.bf16.mxu0 %v1571_v59  ;;  %v1670_v59 = vld [vmem:[%s2279_s1 + $0x3d4] ss:$8 sps:$4 sm:$0xff]  }
  0x3b   :  { %1075 = vmatpush1.bf16.msra.mxu1 %v1573_v60  ;;  %v1665_v60 = vld [vmem:[%s2279_s1 + $0x1d0] ss:$8 sps:$4 sm:$0xff]  }
  0x3c   :  { %1161 = vmatpush1.bf16.msra.mxu0 %v1574_v61  ;;  %1076 = vmatprep.subr.bf16.mxu1 %v1575_v62  ;;  %v1668_v61 = vld [vmem:[%s2279_s1 + $0x3d0] ss:$8 sps:$4 sm:$0xff]   ;;  %v1673_v62 = vld [vmem:[%s2279_s1 + $0x1e4] ss:$8 sps:$4 sm:$0xff]  }
  0x3d   :  { %1162 = vmatprep.subr.bf16.mxu0 %v1577_v63  ;;  %v1676_v63 = vld [vmem:[%s2279_s1 + $0x3e4] ss:$8 sps:$4 sm:$0xff]  }
  0x3f   :  { %1077 = vmatpush1.bf16.msra.mxu1 %v1579_v0  ;;  %v1671_v0 = vld [vmem:[%s2279_s1 + $0x1e0] ss:$8 sps:$4 sm:$0xff]  }
  0x40   :  { %1163 = vmatpush1.bf16.msra.mxu0 %v1580_v1  ;;  %1089 = vmatprep.subr.bf16.mxu1 %v1586_v2  ;;  %v1674_v1 = vld [vmem:[%s2279_s1 + $0x3e0] ss:$8 sps:$4 sm:$0xff]   ;;  %v1679_v2 = vld [vmem:[%s2279_s1 + $0x1f4] ss:$8 sps:$4 sm:$0xff]  }
  0x41   :  { %1175 = vmatprep.subr.bf16.mxu0 %v1592_v3  ;;  %v1682_v3 = vld [vmem:[%s2279_s1 + $0x3f4] ss:$8 sps:$4 sm:$0xff]  }
  0x42   :  { %1079 = vmatmul.mubr.bf16.vlgmr.msra.gmra.mrb[0].mxu1 %v1581_v4  ;;  %v1677_v4 = vld [vmem:[%s2279_s1 + $0x1f0] ss:$8 sps:$4 sm:$0xff]  }
  0x43   :  { %1165 = vmatmul.mubr.bf16.vlgmr.msra.gmra.mrb[0].mxu0 %v1587_v6  ;;  %1090 = vmatpush1.bf16.msra.mxu1 %v1584_v5  ;;  %v1680_v5 = vld [vmem:[%s2279_s1 + $0x3f0] ss:$8 sps:$4 sm:$0xff]   ;;  %v1691_v6 = vld [vmem:[%s2279_s1 + $0x404] ss:$8 sps:$4 sm:$0xff]  }
  0x44   :  { %1176 = vmatpush1.bf16.msra.mxu0 %v1590_v7  ;;  %1091 = vmatprep.subr.bf16.mxu1 %v1595_v8  ;;  %v1683_v7 = vld [vmem:[%s2280_s0 + $0x8] ss:$40 sps:$4 sm:$0xff]   ;;  %v1686_v8 = vld [vmem:[%s2280_s0 + $0x18] ss:$40 sps:$4 sm:$0xff]  }
  0x45   :  { %1177 = vmatprep.subr.bf16.mxu0 %v1598_v9  ;;  %1121 = vmatprep.mubr.bf16.mxu1 %v1685_v34  ;;  %v1689_v9 = vld [vmem:[%s2279_s1 + $0x400] ss:$8 sps:$4 sm:$0xff]  }
  0x46   :  { %1207 = vmatprep.mubr.bf16.mxu0 %v1688_v35  ;;  %v1725_v34 = vld [vmem:[%s2279_s1 + $0x4c0] ss:$8 sps:$4 sm:$0xff]   ;;  %v1730_v35 = vld [vmem:[%s2279_s1 + $0x4d4] ss:$8 sps:$4 sm:$0xff]  }
  0x47   :  { %1092 = vmatpush1.bf16.msra.mxu1 %v1593_v10  ;;  %v1739_v10 = vld [vmem:[%s2280_s0 + $0x24] ss:$40 sps:$4 sm:$0xff]  }
  0x48   :  { %1178 = vmatpush1.bf16.msra.mxu0 %v1596_v11  ;;  %1093 = vmatprep.subr.bf16.mxu1 %v1601_v12  ;;  %v1694_v11 = vld [vmem:[%s2279_s1 + $0x414] ss:$8 sps:$4 sm:$0xff]   ;;  %v1692_v12 = vld [vmem:[%s2279_s1 + $0x410] ss:$8 sps:$4 sm:$0xff]  }
  0x49   :  { %1179 = vmatprep.subr.bf16.mxu0 %v1604_v13  ;;  %v1697_v13 = vld [vmem:[%s2279_s1 + $0x424] ss:$8 sps:$4 sm:$0xff]  }
  0x4b   :  { %1094 = vmatpush1.bf16.msra.mxu1 %v1599_v14  ;;  %v1695_v14 = vld [vmem:[%s2279_s1 + $0x420] ss:$8 sps:$4 sm:$0xff]  }
  0x4c   :  { %1180 = vmatpush1.bf16.msra.mxu0 %v1602_v15  ;;  %1095 = vmatprep.subr.bf16.mxu1 %v1607_v16  ;;  %v1700_v15 = vld [vmem:[%s2279_s1 + $0x434] ss:$8 sps:$4 sm:$0xff]   ;;  %v1698_v16 = vld [vmem:[%s2279_s1 + $0x430] ss:$8 sps:$4 sm:$0xff]  }
  0x4d   :  { %1181 = vmatprep.subr.bf16.mxu0 %v1610_v17  ;;  %v1703_v17 = vld [vmem:[%s2279_s1 + $0x444] ss:$8 sps:$4 sm:$0xff]  }
  0x4f   :  { %1096 = vmatpush1.bf16.msra.mxu1 %v1605_v18  ;;  %v1701_v18 = vld [vmem:[%s2279_s1 + $0x440] ss:$8 sps:$4 sm:$0xff]  }
  0x50   :  { %1182 = vmatpush1.bf16.msra.mxu0 %v1608_v19  ;;  %1097 = vmatprep.subr.bf16.mxu1 %v1613_v20  ;;  %v1706_v19 = vld [vmem:[%s2279_s1 + $0x454] ss:$8 sps:$4 sm:$0xff]   ;;  %v1704_v20 = vld [vmem:[%s2279_s1 + $0x450] ss:$8 sps:$4 sm:$0xff]  }
  0x51   :  { %1183 = vmatprep.subr.bf16.mxu0 %v1616_v21  ;;  %v1709_v21 = vld [vmem:[%s2279_s1 + $0x464] ss:$8 sps:$4 sm:$0xff]  }
  0x53   :  { %1098 = vmatpush1.bf16.msra.mxu1 %v1611_v22  ;;  %v1707_v22 = vld [vmem:[%s2279_s1 + $0x460] ss:$8 sps:$4 sm:$0xff]  }
  0x54   :  { %1184 = vmatpush1.bf16.msra.mxu0 %v1614_v23  ;;  %1099 = vmatprep.subr.bf16.mxu1 %v1619_v24  ;;  %v1712_v23 = vld [vmem:[%s2279_s1 + $0x474] ss:$8 sps:$4 sm:$0xff]   ;;  %v1710_v24 = vld [vmem:[%s2279_s1 + $0x470] ss:$8 sps:$4 sm:$0xff]  }
  0x55   :  { %1185 = vmatprep.subr.bf16.mxu0 %v1622_v25  ;;  %v1715_v25 = vld [vmem:[%s2279_s1 + $0x484] ss:$8 sps:$4 sm:$0xff]  }
  0x57   :  { %1100 = vmatpush1.bf16.msra.mxu1 %v1617_v26  ;;  %v1713_v26 = vld [vmem:[%s2279_s1 + $0x480] ss:$8 sps:$4 sm:$0xff]  }
  0x58   :  { %1186 = vmatpush1.bf16.msra.mxu0 %v1620_v27  ;;  %1101 = vmatprep.subr.bf16.mxu1 %v1625_v28  ;;  %v1718_v27 = vld [vmem:[%s2279_s1 + $0x494] ss:$8 sps:$4 sm:$0xff]   ;;  %v1716_v28 = vld [vmem:[%s2279_s1 + $0x490] ss:$8 sps:$4 sm:$0xff]  }
  0x59   :  { %1187 = vmatprep.subr.bf16.mxu0 %v1628_v29  ;;  %v1721_v29 = vld [vmem:[%s2279_s1 + $0x4a4] ss:$8 sps:$4 sm:$0xff]  }
  0x5b   :  { %1102 = vmatpush1.bf16.msra.mxu1 %v1623_v30  ;;  %v1719_v30 = vld [vmem:[%s2279_s1 + $0x4a0] ss:$8 sps:$4 sm:$0xff]  }
  0x5c   :  { %1188 = vmatpush1.bf16.msra.mxu0 %v1626_v31  ;;  %1103 = vmatprep.subr.bf16.mxu1 %v1631_v32  ;;  %v1724_v31 = vld [vmem:[%s2279_s1 + $0x4b4] ss:$8 sps:$4 sm:$0xff]   ;;  %v1722_v32 = vld [vmem:[%s2279_s1 + $0x4b0] ss:$8 sps:$4 sm:$0xff]  }
  0x5d   :  { %1189 = vmatprep.subr.bf16.mxu0 %v1634_v33  ;;  %v1727_v33 = vld [vmem:[%s2279_s1 + $0x4c4] ss:$8 sps:$4 sm:$0xff]  }
  0x5f   :  { %1104 = vmatpush1.bf16.msra.mxu1 %v1629_v36  ;;  %v1728_v36 = vld [vmem:[%s2279_s1 + $0x4d0] ss:$8 sps:$4 sm:$0xff]  }
  0x60   :  { %1190 = vmatpush1.bf16.msra.mxu0 %v1632_v37  ;;  %1105 = vmatprep.subr.bf16.mxu1 %v1637_v38  ;;  %v1733_v37 = vld [vmem:[%s2279_s1 + $0x4e4] ss:$8 sps:$4 sm:$0xff]   ;;  %v1731_v38 = vld [vmem:[%s2279_s1 + $0x4e0] ss:$8 sps:$4 sm:$0xff]  }
  0x61   :  { %1191 = vmatprep.subr.bf16.mxu0 %v1640_v39  ;;  %v1736_v39 = vld [vmem:[%s2279_s1 + $0x4f4] ss:$8 sps:$4 sm:$0xff]  }
  0x63   :  { %1106 = vmatpush1.bf16.msra.mxu1 %v1635_v40  ;;  %v1734_v40 = vld [vmem:[%s2279_s1 + $0x4f0] ss:$8 sps:$4 sm:$0xff]  }
  0x64   :  { %1192 = vmatpush1.bf16.msra.mxu0 %v1638_v41  ;;  %1107 = vmatprep.subr.bf16.mxu1 %v1643_v42  ;;  %v1737_v41 = vld [vmem:[%s2280_s0 + $0x20] ss:$40 sps:$4 sm:$0xff]  }
  0x65   :  { %1193 = vmatprep.subr.bf16.mxu0 %v1646_v43 }
  0x67   :  { %1108 = vmatpush1.bf16.msra.mxu1 %v1641_v44 }
  0x68   :  { %1194 = vmatpush1.bf16.msra.mxu0 %v1644_v45  ;;  %1109 = vmatprep.subr.bf16.mxu1 %v1649_v46  ;;  %v186_v46 = vlaneseq }
  0x69   :  { %1195 = vmatprep.subr.bf16.mxu0 %v1652_v47 }
  0x6a   :  { %v187_v47 = vshrl.u32 %v186_v46, 7 }
  0x6b   :  { %1110 = vmatpush1.bf16.msra.mxu1 %v1647_v48 }
  0x6c   :  { %1196 = vmatpush1.bf16.msra.mxu0 %v1650_v49  ;;  %1111 = vmatprep.subr.bf16.mxu1 %v1655_v50  ;;  %v188_v48 = vsub.s32 0, %v187_v47  ;;  %v184_v49 = vld [vmem:[%s2281_s2] sm:$0x3]  ;;  %v192_v50 = vsub.s32 1, %v187_v47 }
  0x6d   :  { %1197 = vmatprep.subr.bf16.mxu0 %v1658_v51 }
  0x6e   :  { %v189_v51 = vrot.slane %v184_v49, %v188_v48 }
  0x6f   :  { %1112 = vmatpush1.bf16.msra.mxu1 %v1653_v52  ;;  %v193_v52 = vrot.slane %v184_v49, %v192_v50 }
  0x70   :  { %1198 = vmatpush1.bf16.msra.mxu0 %v1656_v53  ;;  %1113 = vmatprep.subr.bf16.mxu1 %v1661_v54 }
  0x71   :  { %1199 = vmatprep.subr.bf16.mxu0 %v1664_v55 }
  0x73   :  { %1114 = vmatpush1.bf16.msra.mxu1 %v1659_v56 }
  0x74   :  { %1200 = vmatpush1.bf16.msra.mxu0 %v1662_v57  ;;  %1115 = vmatprep.subr.bf16.mxu1 %v1667_v58 }
  0x75   :  { %1201 = vmatprep.subr.bf16.mxu0 %v1670_v59 }
  0x77   :  { %1116 = vmatpush1.bf16.msra.mxu1 %v1665_v60 }
  0x78   :  { %1202 = vmatpush1.bf16.msra.mxu0 %v1668_v61  ;;  %1117 = vmatprep.subr.bf16.mxu1 %v1673_v62 }
  0x79   :  { %1203 = vmatprep.subr.bf16.mxu0 %v1676_v63 }
  0x7b   :  { %1118 = vmatpush1.bf16.msra.mxu1 %v1671_v0 }
  0x7c   :  { %1204 = vmatpush1.bf16.msra.mxu0 %v1674_v1  ;;  %1119 = vmatprep.subr.bf16.mxu1 %v1679_v2 }
  0x7d   :  { %1205 = vmatprep.subr.bf16.mxu0 %v1682_v3 }
  0x7f   :  { %1120 = vmatpush1.bf16.msra.mxu1 %v1677_v4 }
  0x80   :  { %1206 = vmatpush1.bf16.msra.mxu0 %v1680_v5 }
  0x81   :  { %1218 = vmatprep.subr.bf16.mxu0 %v1691_v6 }
  0x82   :  { %1122 = vmatmul.mubr.bf16.vlgmr.msra.gmra.mrb[0].mxu1 %v1683_v7 }
  0x83   :  { %1208 = vmatmul.mubr.bf16.vlgmr.msra.gmra.mrb[0].mxu0 %v1686_v8 }
  0x84   :  { %1219 = vmatpush1.bf16.msra.mxu0 %v1689_v9  ;;  %1250 = vmatprep.mubr.bf16.mxu0 %v1739_v10 }
  0x85   :  { %1220 = vmatprep.subr.bf16.mxu0 %v1694_v11 }
  0x88   :  { %1221 = vmatpush1.bf16.msra.mxu0 %v1692_v12 }
  0x89   :  { %1222 = vmatprep.subr.bf16.mxu0 %v1697_v13 }
  0x8c   :  { %1223 = vmatpush1.bf16.msra.mxu0 %v1695_v14 }
  0x8d   :  { %1224 = vmatprep.subr.bf16.mxu0 %v1700_v15 }
  0x90   :  { %1225 = vmatpush1.bf16.msra.mxu0 %v1698_v16 }
  0x91   :  { %1226 = vmatprep.subr.bf16.mxu0 %v1703_v17 }
  0x94   :  { %1227 = vmatpush1.bf16.msra.mxu0 %v1701_v18 }
  0x95   :  { %1228 = vmatprep.subr.bf16.mxu0 %v1706_v19 }
  0x98   :  { %1229 = vmatpush1.bf16.msra.mxu0 %v1704_v20 }
  0x99   :  { %1230 = vmatprep.subr.bf16.mxu0 %v1709_v21 }
  0x9c   :  { %1231 = vmatpush1.bf16.msra.mxu0 %v1707_v22 }
  0x9d   :  { %1232 = vmatprep.subr.bf16.mxu0 %v1712_v23 }
  0xa0   :  { %1233 = vmatpush1.bf16.msra.mxu0 %v1710_v24 }
  0xa1   :  { %1234 = vmatprep.subr.bf16.mxu0 %v1715_v25 }
  0xa4   :  { %1235 = vmatpush1.bf16.msra.mxu0 %v1713_v26 }
  0xa5   :  { %1236 = vmatprep.subr.bf16.mxu0 %v1718_v27 }
  0xa8   :  { %1237 = vmatpush1.bf16.msra.mxu0 %v1716_v28 }
  0xa9   :  { %1238 = vmatprep.subr.bf16.mxu0 %v1721_v29 }
  0xac   :  { %1239 = vmatpush1.bf16.msra.mxu0 %v1719_v30 }
  0xad   :  { %1240 = vmatprep.subr.bf16.mxu0 %v1724_v31 }
  0xb0   :  { %1241 = vmatpush1.bf16.msra.mxu0 %v1722_v32 }
  0xb1   :  { %1242 = vmatprep.subr.bf16.mxu0 %v1727_v33 }
  0xb4   :  { %1243 = vmatpush1.bf16.msra.mxu0 %v1725_v34 }
  0xb5   :  { %1244 = vmatprep.subr.bf16.mxu0 %v1730_v35 }
  0xb8   :  { %1245 = vmatpush1.bf16.msra.mxu0 %v1728_v36 }
  0xb9   :  { %1246 = vmatprep.subr.bf16.mxu0 %v1733_v37 }
  0xbc   :  { %1247 = vmatpush1.bf16.msra.mxu0 %v1731_v38 }
  0xbd   :  { %1248 = vmatprep.subr.bf16.mxu0 %v1736_v39 }
  0xc0   :  { %1249 = vmatpush1.bf16.msra.mxu0 %v1734_v40 }
  0xc3   :  { %1251 = vmatmul.mubr.bf16.vlgmr.msra.gmra.mrb[0].mxu0 %v1737_v41 }
 0x155   :  { %v1123_v42 = vpop.f32.mrb[0].mxu1 }
 0x156   :  { %v1125_v43 = vpop.f32.mrb[1].mxu1  ;;  %v1465_v53 = vadd.f32 %v1123_v42, %v189_v51 }
 0x157   :  { %v1127_v44 = vpop.f32.mrb[2].mxu1  ;;  %v1467_v54 = vadd.f32 %v1125_v43, %v193_v52 }
 0x158   :  { %v1129_v45 = vpop.f32.mrb[3].mxu1  ;;  %v1469_v56 = vadd.f32 %v1127_v44, %v189_v51 }
 0x159   :  { %v1471_v59 = vadd.f32 %v1129_v45, %v193_v52 }
 0x196   :  { %v1252_v55 = vpop.f32.mrb[0].mxu0 }
 0x197   :  { %v1466_v57 = vadd.f32 %v1465_v53, %v1252_v55  ;;  %v1254_v58 = vpop.f32.mrb[1].mxu0 }
 0x198   :  { %v1468_v60 = vadd.f32 %v1467_v54, %v1254_v58  ;;  %v1256_v61 = vpop.f32.mrb[2].mxu0 }
 0x199   :  { %vm1261_vm0 = vcmp.ge.f32.partialorder %v1466_v57, 0.0  ;;  %v1265_v62 = vmul.f32 0.01, %v1466_v57  ;;  %v1470_v63 = vadd.f32 %v1469_v56, %v1256_v61  ;;  %v1258_v0 = vpop.f32.mrb[3].mxu0 }
 0x19a   :  { %vm1262_vm1 = vcmp.ge.f32.partialorder %v1468_v60, 0.0  ;;  %v1266_v1 = vmul.f32 0.01, %v1468_v60  ;;  %v1472_v2 = vadd.f32 %v1471_v59, %v1258_v0 }
 0x19b   :  { %v1269_v3 = vsel %vm1261_vm0, %v1466_v57, %v1265_v62  ;;  %vm1263_vm2 = vcmp.ge.f32.partialorder %v1470_v63, 0.0  ;;  %v1267_v4 = vmul.f32 0.01, %v1470_v63 }
 0x19c   :  { %v1270_v5 = vsel %vm1262_vm1, %v1468_v60, %v1266_v1  ;;  %vm1264_vm3 = vcmp.ge.f32.partialorder %v1472_v2, 0.0  ;;  %v1268_v6 = vmul.f32 0.01, %v1472_v2 }
 0x19d   :  { %v1463_v7 = vpack.c.bf16 %v1270_v5, %v1269_v3  ;;  %v1271_v8 = vsel %vm1263_vm2, %v1470_v63, %v1267_v4 }
 0x19e   :  { %v1272_v9 = vsel %vm1264_vm3, %v1472_v2, %v1268_v6 }
 0x19f   :  { %1285 = vst [vmem:[%s2282_s3] sm:$0xff] %v1463_v7  ;;  %v1464_v10 = vpack.c.bf16 %v1272_v9, %v1271_v8 }
 0x1a1   :  { %1286 = vst [vmem:[%s2282_s3 + $0x8] sm:$0xff] %v1464_v10 }

// kernel: submpd_forward.9
= control target key start
LH: loop header
LB: loop body
LE: loop exit
PB: predicated region body
PF: predicated region fallthrough
CT: control target
= control target key end

     0   :  { %s940_s1 = inlined_call_operand.vmem [shape: bf16[768,128], index: 1, kind: input, shape index: {}]   ;;  %s941_s0 = inlined_call_operand.vmem [shape: bf16[16,768], index: 0, kind: input, shape index: {}]   ;;  %s942_s2 = inlined_call_operand.vmem [shape: f32[1,128], index: 2, kind: input, shape index: {}]   ;;  %s943_s3 = inlined_call_operand.vmem [shape: f32[16,128], index: 3, kind: output, shape index: {}]  }
   0x1   :  { %v692_v0 = vld [vmem:[%s940_s1 + $0x40] sm:$0xff]   ;;  %v696_v4 = vld [vmem:[%s940_s1 + $0x48] sm:$0xff]   ;;  %v700_v8 = vld [vmem:[%s940_s1 + $0x50] sm:$0xff]  }
   0x2   :  { %v693_v1 = vld [vmem:[%s940_s1] sm:$0xff]   ;;  %626 = vmatprep.subr.bf16.mxu0 %v692_v0  ;;  %v697_v5 = vld [vmem:[%s940_s1 + $0x8] sm:$0xff]   ;;  %v701_v9 = vld [vmem:[%s940_s1 + $0x10] sm:$0xff]  }
   0x3   :  { %v694_v2 = vld [vmem:[%s940_s1 + $0xc0] sm:$0xff]   ;;  %627 = vmatpush3.bf16.msra.mxu0 %v693_v1  ;;  %v698_v6 = vld [vmem:[%s940_s1 + $0xc8] sm:$0xff]   ;;  %v702_v10 = vld [vmem:[%s940_s1 + $0xd0] sm:$0xff]  }
   0x4   :  { %v695_v3 = vld [vmem:[%s940_s1 + $0x80] sm:$0xff]   ;;  %648 = vmatprep.subr.bf16.mxu1 %v694_v2  ;;  %628 = vmatprep.subr.bf16.mxu0 %v696_v4  ;;  %v699_v7 = vld [vmem:[%s940_s1 + $0x88] sm:$0xff]   ;;  %v703_v11 = vld [vmem:[%s940_s1 + $0x90] sm:$0xff]  }
   0x5   :  { %649 = vmatpush3.bf16.msra.mxu1 %v695_v3  ;;  %v704_v12 = vld [vmem:[%s940_s1 + $0x58] sm:$0xff]   ;;  %v708_v16 = vld [vmem:[%s940_s1 + $0x60] sm:$0xff]   ;;  %v712_v20 = vld [vmem:[%s940_s1 + $0x68] sm:$0xff]  }
   0x6   :  { %650 = vmatprep.subr.bf16.mxu1 %v698_v6  ;;  %v705_v13 = vld [vmem:[%s940_s1 + $0x18] sm:$0xff]   ;;  %v709_v17 = vld [vmem:[%s940_s1 + $0x20] sm:$0xff]   ;;  %v713_v21 = vld [vmem:[%s940_s1 + $0x28] sm:$0xff]  }
   0x7   :  { %629 = vmatpush3.bf16.msra.mxu0 %v697_v5  ;;  %v706_v14 = vld [vmem:[%s940_s1 + $0xd8] sm:$0xff]   ;;  %v710_v18 = vld [vmem:[%s940_s1 + $0xe0] sm:$0xff]   ;;  %v714_v22 = vld [vmem:[%s940_s1 + $0xe8] sm:$0xff]  }
   0x8   :  { %630 = vmatprep.subr.bf16.mxu0 %v700_v8  ;;  %v707_v15 = vld [vmem:[%s940_s1 + $0x98] sm:$0xff]   ;;  %v711_v19 = vld [vmem:[%s940_s1 + $0xa0] sm:$0xff]   ;;  %v715_v23 = vld [vmem:[%s940_s1 + $0xa8] sm:$0xff]  }
   0x9   :  { %651 = vmatpush3.bf16.msra.mxu1 %v699_v7  ;;  %v716_v24 = vld [vmem:[%s940_s1 + $0x70] sm:$0xff]   ;;  %v720_v28 = vld [vmem:[%s940_s1 + $0x78] sm:$0xff]   ;;  %v727_v34 = vld [vmem:[%s940_s1 + $0x140] sm:$0xff]  }
   0xa   :  { %652 = vmatprep.subr.bf16.mxu1 %v702_v10  ;;  %v717_v25 = vld [vmem:[%s940_s1 + $0x30] sm:$0xff]   ;;  %v721_v29 = vld [vmem:[%s940_s1 + $0x38] sm:$0xff]   ;;  %v728_v35 = vld [vmem:[%s941_s0 + $0x8] ss:$24 sps:$4 sm:$0xff]  }
   0xb   :  { %631 = vmatpush3.bf16.msra.mxu0 %v701_v9  ;;  %v718_v26 = vld [vmem:[%s940_s1 + $0xf0] sm:$0xff]   ;;  %v722_v30 = vld [vmem:[%s940_s1 + $0xf8] sm:$0xff]   ;;  %v730_v36 = vld [vmem:[%s941_s0 + $0xc] ss:$24 sps:$4 sm:$0xff]  }
   0xc   :  { %632 = vmatprep.subr.bf16.mxu0 %v704_v12  ;;  %v719_v27 = vld [vmem:[%s940_s1 + $0xb0] sm:$0xff]   ;;  %v723_v31 = vld [vmem:[%s941_s0] ss:$24 sps:$4 sm:$0xff]   ;;  %v725_v32 = vld [vmem:[%s941_s0 + $0x4] ss:$24 sps:$4 sm:$0xff]   ;;  %515 = vmatprep.mubr.bf16.mxu1 %v730_v36 }
   0xd   :  { %653 = vmatpush3.bf16.msra.mxu1 %v703_v11  ;;  %v726_v33 = vld [vmem:[%s940_s1 + $0xb8] sm:$0xff]   ;;  %474 = vmatprep.mubr.bf16.mxu0 %v725_v32  ;;  %v731_v37 = vld [vmem:[%s940_s1 + $0x100] sm:$0xff]   ;;  %v732_v38 = vld [vmem:[%s940_s1 + $0x148] sm:$0xff]  }
   0xe   :  { %654 = vmatprep.subr.bf16.mxu1 %v706_v14  ;;  %v733_v39 = vld [vmem:[%s940_s1 + $0x108] sm:$0xff]   ;;  %v734_v40 = vld [vmem:[%s940_s1 + $0x150] sm:$0xff]   ;;  %v736_v42 = vld [vmem:[%s940_s1 + $0x158] sm:$0xff]  }
   0xf   :  { %633 = vmatpush3.bf16.msra.mxu0 %v705_v13  ;;  %v735_v41 = vld [vmem:[%s940_s1 + $0x110] sm:$0xff]   ;;  %v737_v43 = vld [vmem:[%s940_s1 + $0x118] sm:$0xff]   ;;  %v738_v44 = vld [vmem:[%s940_s1 + $0x160] sm:$0xff]  }
  0x10   :  { %634 = vmatprep.subr.bf16.mxu0 %v708_v16  ;;  %v739_v45 = vld [vmem:[%s940_s1 + $0x120] sm:$0xff]   ;;  %v740_v46 = vld [vmem:[%s940_s1 + $0x168] sm:$0xff]   ;;  %v742_v49 = vld [vmem:[%s940_s1 + $0x170] sm:$0xff]  }
  0x11   :  { %655 = vmatpush3.bf16.msra.mxu1 %v707_v15  ;;  %v748_v47 = vld [vmem:[%s941_s0 + $0x14] ss:$24 sps:$4 sm:$0xff]   ;;  %v744_v51 = vld [vmem:[%s940_s1 + $0x178] sm:$0xff]   ;;  %v746_v53 = vld [vmem:[%s941_s0 + $0x10] ss:$24 sps:$4 sm:$0xff]  }
  0x12   :  { %656 = vmatprep.subr.bf16.mxu1 %v710_v18  ;;  %v741_v48 = vld [vmem:[%s940_s1 + $0x128] sm:$0xff]   ;;  %v743_v50 = vld [vmem:[%s940_s1 + $0x130] sm:$0xff]   ;;  %v745_v52 = vld [vmem:[%s940_s1 + $0x138] sm:$0xff]  }
  0x13   :  { %635 = vmatpush3.bf16.msra.mxu0 %v709_v17  ;;  %v571_v55 = vld [vmem:[%s942_s2] ss:$0 sm:$0xff] }
  0x14   :  { %636 = vmatprep.subr.bf16.mxu0 %v712_v20 }
  0x15   :  { %657 = vmatpush3.bf16.msra.mxu1 %v711_v19 }
  0x16   :  { %658 = vmatprep.subr.bf16.mxu1 %v714_v22 }
  0x17   :  { %637 = vmatpush3.bf16.msra.mxu0 %v713_v21 }
  0x18   :  { %638 = vmatprep.subr.bf16.mxu0 %v716_v24 }
  0x19   :  { %659 = vmatpush3.bf16.msra.mxu1 %v715_v23 }
  0x1a   :  { %660 = vmatprep.subr.bf16.mxu1 %v718_v26 }
  0x1b   :  { %639 = vmatpush3.bf16.msra.mxu0 %v717_v25 }
  0x1c   :  { %640 = vmatprep.subr.bf16.mxu0 %v720_v28 }
  0x1d   :  { %661 = vmatpush3.bf16.msra.mxu1 %v719_v27 }
  0x1e   :  { %662 = vmatprep.subr.bf16.mxu1 %v722_v30 }
  0x1f   :  { %641 = vmatpush3.bf16.msra.mxu0 %v721_v29 }
  0x20   :  { %670 = vmatprep.subr.bf16.mxu0 %v727_v34 }
  0x21   :  { %663 = vmatpush3.bf16.msra.mxu1 %v726_v33 }
  0x22   :  { %475 = vmatmul.mubr.bf16.vlgmr.msra.gmra.mrb[0].mxu0 %v723_v31 }
  0x23   :  { %671 = vmatpush3.bf16.msra.mxu0 %v731_v37  ;;  %556 = vmatprep.mubr.bf16.mxu0 %v748_v47 }
  0x24   :  { %516 = vmatmul.mubr.bf16.vlgmr.msra.gmra.mrb[0].mxu1 %v728_v35  ;;  %672 = vmatprep.subr.bf16.mxu0 %v732_v38 }
  0x27   :  { %673 = vmatpush3.bf16.msra.mxu0 %v733_v39 }
  0x28   :  { %674 = vmatprep.subr.bf16.mxu0 %v734_v40 }
  0x2b   :  { %675 = vmatpush3.bf16.msra.mxu0 %v735_v41 }
  0x2c   :  { %676 = vmatprep.subr.bf16.mxu0 %v736_v42 }
  0x2f   :  { %677 = vmatpush3.bf16.msra.mxu0 %v737_v43 }
  0x30   :  { %678 = vmatprep.subr.bf16.mxu0 %v738_v44 }
  0x33   :  { %679 = vmatpush3.bf16.msra.mxu0 %v739_v45 }
  0x34   :  { %680 = vmatprep.subr.bf16.mxu0 %v740_v46 }
  0x37   :  { %681 = vmatpush3.bf16.msra.mxu0 %v741_v48 }
  0x38   :  { %682 = vmatprep.subr.bf16.mxu0 %v742_v49 }
  0x3b   :  { %683 = vmatpush3.bf16.msra.mxu0 %v743_v50 }
  0x3c   :  { %684 = vmatprep.subr.bf16.mxu0 %v744_v51 }
  0x3f   :  { %685 = vmatpush3.bf16.msra.mxu0 %v745_v52 }
  0x42   :  { %557 = vmatmul.mubr.bf16.vlgmr.msra.gmra.mrb[4].mxu0 %v746_v53 }
  0xf5   :  { %v642_v54 = vpop.f32.mrb[0].mxu0 }
  0xf6   :  { %v643_v56 = vpop.f32.mrb[1].mxu0 }
  0xf7   :  { %v644_v57 = vadd.f32 %v643_v56, %v642_v54  ;;  %v645_v58 = vpop.f32.mrb[2].mxu0  ;;  %v664_v59 = vpop.f32.mrb[0].mxu1 }
  0xf8   :  { %v646_v60 = vpop.f32.mrb[3].mxu0  ;;  %v665_v63 = vpop.f32.mrb[1].mxu1 }
  0xf9   :  { %v477_v61 = vadd.f32 %v644_v57, %v571_v55  ;;  %v647_v62 = vadd.f32 %v646_v60, %v645_v58  ;;  %v666_v0 = vadd.f32 %v665_v63, %v664_v59  ;;  %v667_v1 = vpop.f32.mrb[2].mxu1 }
  0xfa   :  { %v668_v3 = vpop.f32.mrb[3].mxu1 }
  0xfb   :  { %v480_v2 = vadd.f32 %v647_v62, %v571_v55  ;;  %v518_v4 = vadd.f32 %v666_v0, %v477_v61  ;;  %v669_v5 = vadd.f32 %v668_v3, %v667_v1 }
  0xfd   :  { %v521_v6 = vadd.f32 %v669_v5, %v480_v2 }
 0x115   :  { %v686_v7 = vpop.f32.mrb[4].mxu0 }
 0x116   :  { %v687_v8 = vpop.f32.mrb[5].mxu0 }
 0x117   :  { %v688_v9 = vadd.f32 %v687_v8, %v686_v7  ;;  %v689_v10 = vpop.f32.mrb[6].mxu0 }
 0x118   :  { %v690_v11 = vpop.f32.mrb[7].mxu0 }
 0x119   :  { %v559_v12 = vadd.f32 %v688_v9, %v518_v4  ;;  %v691_v13 = vadd.f32 %v690_v11, %v689_v10 }
 0x11b   :  { %565 = vst [vmem:[%s943_s3] sm:$0xff] %v559_v12  ;;  %v562_v14 = vadd.f32 %v691_v13, %v521_v6 }
 0x11d   :  { %566 = vst [vmem:[%s943_s3 + $0x8] sm:$0xff] %v562_v14 }

</bundles_post_ra>
